<compile_context>
chip_gen: v6e
topology: v6e:2x2x1
jax: 0.10.0
libtpu: 0.0.40
codegen_flags: <defaults>
</compile_context>

<pallas_src>
from functools import partial

import jax
import jax.numpy as jnp
from jax.experimental import pallas as pl
from jax.experimental.pallas import tpu as pltpu

EPS = 1e-5          # torch.nn.InstanceNorm1d default (affine=False)
NEG_SLOPE = 0.01    # leakyrelu negative_slope


def _lrelu(x):
    return jnp.where(x >= 0, x, NEG_SLOPE * x)


def _instance_norm(x):
    """Two-pass instance norm over the vertex axis.

    x: (N, H) f32 tile.  Normalise each channel (lane) over N (sublanes),
    biased variance, no affine -- matches torch InstanceNorm1d defaults.
    Two-pass (x - mean)^2 avoids the cancellation of E[x^2] - E[x]^2.
    """
    n = x.shape[0]
    mean = jnp.sum(x, axis=0, keepdims=True) * (1.0 / n)
    d = x - mean
    var = jnp.sum(d * d, axis=0, keepdims=True) * (1.0 / n)
    return d * jax.lax.rsqrt(var + EPS)


# ---------------------------------------------------------------------------
# Pallas kernels (grid = (B // bt,), bt batch elements per grid step)
# ---------------------------------------------------------------------------
def stage1_kernel(feat_ref, gath_ref, w1s_ref, w1n_ref, b1_ref, xact_ref):
    # GraphConv fc split as self + neighbor matmuls (no (N, 6C) concat in HBM),
    # then instance norm + leakyrelu.
    bt = feat_ref.shape[0]
    w1s = w1s_ref[...]          # (C, H)   resident across the bt loop
    w1n = w1n_ref[...]          # (K*C, H)
    b1 = b1_ref[...]            # (1, H) f32
    for i in range(bt):         # bt is small & static
        x = jnp.dot(feat_ref[i], w1s, preferred_element_type=jnp.float32)
        x = x + jnp.dot(gath_ref[i], w1n, preferred_element_type=jnp.float32)
        x = x + b1
        xact_ref[i] = _lrelu(_instance_norm(x)).astype(xact_ref.dtype)


def stage2_kernel(xact_ref, gath_ref, feat_ref, w2s_ref, w2n_ref, b2_ref,
                  w3_ref, b3_ref, w4_ref, out_ref):
    # conv2 (split self/neighbor) -> norm2 ; conv3 -> norm3 (residual, f32,
    # never leaves VMEM) ; add ; leakyrelu ; conv4 as VPU mul + lane reduce.
    bt = xact_ref.shape[0]
    w2s = w2s_ref[...]          # (H, H)
    w2n = w2n_ref[...]          # (K*H, H)
    b2 = b2_ref[...]            # (1, H) f32
    w3 = w3_ref[...]            # (C, H)
    b3 = b3_ref[...]            # (1, H) f32
    w4 = w4_ref[...]            # (1, H) f32
    for i in range(bt):
        y = jnp.dot(xact_ref[i], w2s, preferred_element_type=jnp.float32)
        y = y + jnp.dot(gath_ref[i], w2n, preferred_element_type=jnp.float32)
        y = _instance_norm(y + b2)
        r = jnp.dot(feat_ref[i], w3, preferred_element_type=jnp.float32) + b3
        y = _lrelu(y + _instance_norm(r))
        # conv4: Linear(H -> 1, bias=False).  Output is tiny, skip the MXU.
        out_ref[i] = jnp.sum(y * w4, axis=-1, keepdims=True).astype(out_ref.dtype)


# ---------------------------------------------------------------------------
# VMEM / tiling helpers
# ---------------------------------------------------------------------------
def _vmem_capacity_bytes():
    try:
        return int(pltpu.get_tpu_info().vmem_capacity_bytes)
    except Exception:
        return 64 * 1024 * 1024      # v7x-safe fallback


def _pick_batch_tile(B, per_batch_bytes, budget_bytes):
    """Largest divisor of B whose double-buffered blocks fit the budget,
    keeping >= 2 grid steps when B >= 2 (both v7x TensorCores get work)."""
    best = 1
    for bt in range(1, B + 1):
        if B % bt:
            continue
        if bt > 1 and (B // bt) < 2:
            continue
        if 2 * bt * per_batch_bytes <= budget_bytes:
            best = bt
    return best


# ---------------------------------------------------------------------------
# JAX wrapper
# ---------------------------------------------------------------------------
@partial(jax.jit, static_argnames=("compute_dtype",))
def feature2delta(features, neighbors_index, params, *,
                  compute_dtype=jnp.bfloat16):
    B, N, C = features.shape
    K = neighbors_index.shape[-1]
    H = C // 2
    w1, b1 = params["w1"], params["b1"]      # (H, 6C), (H,)  PyTorch layout
    w2, b2 = params["w2"], params["b2"]      # (H, 6H), (H,)
    w3, b3 = params["w3"], params["b3"]      # (H, C),  (H,)
    w4 = params["w4"]                        # (1, H)
    assert w1.shape[1] == (K + 1) * C, "GraphConv expects K=5 neighbors (6*in)"

    cdt = compute_dtype
    esz = jnp.dtype(cdt).itemsize

    # Weights in (in, out) layout so kernel matmuls are (N, in) @ (in, out).
    w1s = w1[:, :C].T.astype(cdt)            # (C, H)   self
    w1n = w1[:, C:].T.astype(cdt)            # (K*C, H) neighbors
    b1r = b1.reshape(1, H).astype(jnp.float32)
    w2s = w2[:, :H].T.astype(cdt)            # (H, H)
    w2n = w2[:, H:].T.astype(cdt)            # (K*H, H)
    b2r = b2.reshape(1, H).astype(jnp.float32)
    w3t = w3.T.astype(cdt)                   # (C, H)
    b3r = b3.reshape(1, H).astype(jnp.float32)
    w4r = w4.reshape(1, H).astype(jnp.float32)

    feat = features.astype(cdt)              # (B, N, C) channels-last, as given

    def gather(x):
        # torch.index_select(inputs.flatten(0,1), 0, idx.view(-1)) semantics:
        # flat indices may cross batch boundaries.  Row gather, no transposes.
        # TODO(synk): in-kernel gather via scalar-prefetched indices.
        F = x.shape[-1]
        g = jnp.take(x.reshape(B * N, F), neighbors_index.reshape(-1), axis=0)
        return g.reshape(B, N, K * F)        # column order (k major, f minor)

    gath1 = gather(feat)                     # (B, N, K*C)

    # ---- VMEM budgeting / batch tiling ------------------------------------
    vmem_cap = _vmem_capacity_bytes()
    per_b1 = N * (C + K * C + H) * esz                   # stage-1 blocks / batch
    per_b2 = N * (H + K * H + C) * esz + N * 4           # stage-2 blocks / batch
    bt = _pick_batch_tile(B, max(per_b1, per_b2), int(0.45 * vmem_cap))
    grid = (B // bt,)

    w_bytes1 = (C * H + K * C * H) * esz + H * 4
    w_bytes2 = (H * H + K * H * H + C * H) * esz + 3 * H * 4

    def vmem_limit(per_b, w_bytes):
        need = 2 * bt * per_b + 2 * w_bytes          # double-buffered blocks
        need = int(need * 1.25) + (4 << 20)          # headroom for scratch
        return max(32 << 20, min(need, int(0.9 * vmem_cap)))

    cp1 = pltpu.CompilerParams(dimension_semantics=("parallel",),
                               vmem_limit_bytes=vmem_limit(per_b1, w_bytes1))
    cp2 = pltpu.CompilerParams(dimension_semantics=("parallel",),
                               vmem_limit_bytes=vmem_limit(per_b2, w_bytes2))

    ce1 = pl.CostEstimate(flops=2 * B * N * H * (C + K * C),
                          transcendentals=B * H,
                          bytes_accessed=B * per_b1 + w_bytes1)
    ce2 = pl.CostEstimate(flops=2 * B * N * H * (H + K * H + C) + 2 * B * N * H,
                          transcendentals=2 * B * H,
                          bytes_accessed=B * per_b2 + w_bytes2)

    # ---- stage 1: conv1 -> norm1 -> lrelu ----------------------------------
    xact = pl.pallas_call(
        stage1_kernel,
        out_shape=jax.ShapeDtypeStruct((B, N, H), cdt),
        grid_spec=pltpu.PrefetchScalarGridSpec(
            num_scalar_prefetch=0,
            grid=grid,
            in_specs=[
                pl.BlockSpec((bt, N, C), lambda g: (g, 0, 0)),
                pl.BlockSpec((bt, N, K * C), lambda g: (g, 0, 0)),
                pl.BlockSpec((C, H), lambda g: (0, 0)),
                pl.BlockSpec((K * C, H), lambda g: (0, 0)),
                pl.BlockSpec((1, H), lambda g: (0, 0)),
            ],
            out_specs=pl.BlockSpec((bt, N, H), lambda g: (g, 0, 0))),
        compiler_params=cp1,
        cost_estimate=ce1,
    )(feat, gath1, w1s, w1n, b1r)

    gath2 = gather(xact)                     # (B, N, K*H)

    # ---- stage 2: conv2 -> norm2 ; conv3 -> norm3 ; add ; lrelu ; conv4 ----
    out = pl.pallas_call(
        stage2_kernel,
        out_shape=jax.ShapeDtypeStruct((B, N, 1), jnp.float32),
        grid_spec=pltpu.PrefetchScalarGridSpec(
            num_scalar_prefetch=0,
            grid=grid,
            in_specs=[
                pl.BlockSpec((bt, N, H), lambda g: (g, 0, 0)),
                pl.BlockSpec((bt, N, K * H), lambda g: (g, 0, 0)),
                pl.BlockSpec((bt, N, C), lambda g: (g, 0, 0)),
                pl.BlockSpec((H, H), lambda g: (0, 0)),
                pl.BlockSpec((K * H, H), lambda g: (0, 0)),
                pl.BlockSpec((1, H), lambda g: (0, 0)),
                pl.BlockSpec((C, H), lambda g: (0, 0)),
                pl.BlockSpec((1, H), lambda g: (0, 0)),
                pl.BlockSpec((1, H), lambda g: (0, 0)),
            ],
            out_specs=pl.BlockSpec((bt, N, 1), lambda g: (g, 0, 0))),
        compiler_params=cp2,
        cost_estimate=ce2,
    )(xact, gath2, feat, w2s, w2n, b2r, w3t, b3r, w4r)

    return out                               # (B, N, 1) float32


# ---------------------------------------------------------------------------
# Pure-JAX reference (PyTorch semantics, HIGHEST precision)
# ---------------------------------------------------------------------------
def reference(features, neighbors_index, p):
    hi = jax.lax.Precision.HIGHEST

    def inorm(x):  # (B, N, C): normalize over N per (batch, channel)
        m = jnp.mean(x, axis=1, keepdims=True)
        v = jnp.mean((x - m) ** 2, axis=1, keepdims=True)
        return (x - m) / jnp.sqrt(v + EPS)

    def gconv(x, w, b):
        B, N, F = x.shape
        K = neighbors_index.shape[-1]
        g = jnp.take(x.reshape(B * N, F), neighbors_index.reshape(-1), axis=0)
        g = g.reshape(B, N, K * F)
        cat = jnp.concatenate([x, g], axis=-1)
        return jnp.dot(cat, w.T, precision=hi) + b

    x = _lrelu(inorm(gconv(features, p["w1"], p["b1"])))
    x = inorm(gconv(x, p["w2"], p["b2"]))
    r = inorm(jnp.dot(features, p["w3"].T, precision=hi) + p["b3"])
    x = _lrelu(x + r)
    return jnp.dot(x, p["w4"].T, precision=hi)


# ---------------------------------------------------------------------------
# Parameter init (deterministic, PyTorch weight layout (out, in))
# ---------------------------------------------------------------------------
def init_params(key, in_channels):
    C, H = in_channels, in_channels // 2
    ks = jax.random.split(key, 6)
    scale = 0.05
    return {
        "w1": scale * jax.random.normal(ks[0], (H, 6 * C), jnp.float32),
        "b1": scale * jax.random.normal(ks[1], (H,), jnp.float32),
        "w2": scale * jax.random.normal(ks[2], (H, 6 * H), jnp.float32),
        "b2": scale * jax.random.normal(ks[3], (H,), jnp.float32),
        "w3": scale * jax.random.normal(ks[4], (H, C), jnp.float32),
        "b3": scale * jax.random.normal(ks[5], (H,), jnp.float32),
        # conv4: Linear(H, 1, bias=False), zero-initialized in __init__
        "w4": jnp.zeros((1, H), jnp.float32),
    }


if __name__ == "__main__":
    B, N, C, K = 4, 16, 32, 5   # K=5 neighbors -> GraphConv input = 6*in_features

    key = jax.random.PRNGKey(0)
    k_feat, k_idx, k_par, k_w4 = jax.random.split(key, 4)

    features = jax.random.normal(k_feat, (B, N, C), jnp.float32)
    neighbors_index = jax.random.randint(
        k_idx, (B, N, K), 0, B * N, dtype=jnp.int32)

    # Module-faithful params (conv4 zero-initialized) -> output must be zero.
    params = init_params(k_par, C)
    out0 = jax.block_until_ready(
        feature2delta(features, neighbors_index, params,
                      compute_dtype=jnp.float32))
    assert out0.shape == (B, N, 1), out0.shape
    assert jnp.allclose(out0, 0.0), "zero-init conv4 must give zero output"

    # Nonzero conv4 weight so stage-1/stage-2 numerics are actually validated.
    params_nz = dict(params)
    params_nz["w4"] = 0.1 * jax.random.normal(k_w4, (1, C // 2), jnp.float32)

    ref = reference(features, neighbors_index, params_nz)

    out_f32 = jax.block_until_ready(
        feature2delta(features, neighbors_index, params_nz,
                      compute_dtype=jnp.float32))
    err = float(jnp.max(jnp.abs(out_f32 - ref)))
    assert jnp.allclose(out_f32, ref, atol=2e-3, rtol=2e-3), f"f32 mismatch {err}"

    # Default path: bf16 storage (HBM-bandwidth optimization); loose check.
    out_bf16 = jax.block_until_ready(
        feature2delta(features, neighbors_index, params_nz))
    err_bf16 = float(jnp.max(jnp.abs(out_bf16 - ref)))
    assert jnp.allclose(out_bf16, ref, atol=1e-1, rtol=1e-1), \
        f"bf16 mismatch {err_bf16}"

    print("KERNEL_OK")
</pallas_src>

<mosaic_0001>
module attributes {stable_mosaic.version = 11 : i64} {
  func.func @stage1_kernel(%arg0: i32, %arg1: memref<2x16x32xf32, #tpu.memory_space<vmem>>, %arg2: memref<2x16x160xf32, #tpu.memory_space<vmem>>, %arg3: memref<32x16xf32, #tpu.memory_space<vmem>>, %arg4: memref<160x16xf32, #tpu.memory_space<vmem>>, %arg5: memref<1x16xf32, #tpu.memory_space<vmem>>, %arg6: memref<2x16x16xf32, #tpu.memory_space<vmem>>) attributes {dimension_semantics = [#tpu.dimension_semantics<parallel>], iteration_bounds = array<i64: 2>, scalar_prefetch = 0 : i64, scratch_operands = 0 : i64, tpu.core_type = #tpu.core_type<tc>, window_params = [{transform_indices = @transform_0, window_bounds = array<i64: 2, 16, 32>}, {transform_indices = @transform_1, window_bounds = array<i64: 2, 16, 160>}, {pipeline_mode = #tpu.pipeline_mode<synchronous>, transform_indices = @transform_2, window_bounds = array<i64: 32, 16>}, {pipeline_mode = #tpu.pipeline_mode<synchronous>, transform_indices = @transform_3, window_bounds = array<i64: 160, 16>}, {pipeline_mode = #tpu.pipeline_mode<synchronous>, transform_indices = @transform_4, window_bounds = array<i64: 1, 16>}, {transform_indices = @transform_5, window_bounds = array<i64: 2, 16, 16>}]} {
    %c0 = arith.constant 0 : index
    %c0_0 = arith.constant 0 : index
    %0 = vector.load %arg3[%c0, %c0_0] : memref<32x16xf32, #tpu.memory_space<vmem>>, vector<32x16xf32>
    %c0_1 = arith.constant 0 : index
    %c0_2 = arith.constant 0 : index
    %1 = vector.load %arg4[%c0_1, %c0_2] : memref<160x16xf32, #tpu.memory_space<vmem>>, vector<160x16xf32>
    %c0_3 = arith.constant 0 : index
    %c0_4 = arith.constant 0 : index
    %2 = vector.load %arg5[%c0_3, %c0_4] : memref<1x16xf32, #tpu.memory_space<vmem>>, vector<1x16xf32>
    %c0_5 = arith.constant 0 : index
    %c0_6 = arith.constant 0 : index
    %c0_7 = arith.constant 0 : index
    %3 = vector.load %arg1[%c0_5, %c0_6, %c0_7] : memref<2x16x32xf32, #tpu.memory_space<vmem>>, vector<1x16x32xf32>
    %4 = vector.shape_cast %3 : vector<1x16x32xf32> to vector<16x32xf32>
    %cst = arith.constant dense<0.000000e+00> : vector<16x16xf32>
    %5 = tpu.matmul %4, %0, %cst {dimension_numbers = #tpu.dot_dimension_numbers<[1], [0], [0], [1], [0, 0, 1, 1], [], []>} : vector<16x32xf32>, vector<32x16xf32>, vector<16x16xf32> -> vector<16x16xf32>
    %c0_8 = arith.constant 0 : index
    %c0_9 = arith.constant 0 : index
    %c0_10 = arith.constant 0 : index
    %6 = vector.load %arg2[%c0_8, %c0_9, %c0_10] : memref<2x16x160xf32, #tpu.memory_space<vmem>>, vector<1x16x160xf32>
    %7 = vector.shape_cast %6 : vector<1x16x160xf32> to vector<16x160xf32>
    %cst_11 = arith.constant dense<0.000000e+00> : vector<16x16xf32>
    %8 = tpu.matmul %7, %1, %cst_11 {dimension_numbers = #tpu.dot_dimension_numbers<[1], [0], [0], [1], [0, 0, 1, 1], [], []>} : vector<16x160xf32>, vector<160x16xf32>, vector<16x16xf32> -> vector<16x16xf32>
    %9 = arith.addf %5, %8 : vector<16x16xf32>
    %10 = vector.broadcast %2 : vector<1x16xf32> to vector<16x16xf32>
    %11 = arith.addf %9, %10 : vector<16x16xf32>
    %cst_12 = arith.constant dense<0.000000e+00> : vector<16xf32>
    %12 = vector.multi_reduction <add>, %11, %cst_12 [0] : vector<16x16xf32> to vector<16xf32>
    %13 = vector.shape_cast %12 : vector<16xf32> to vector<1x16xf32>
    %cst_13 = arith.constant 6.250000e-02 : f32
    %14 = vector.broadcast %cst_13 : f32 to vector<1x16xf32>
    %15 = arith.mulf %13, %14 : vector<1x16xf32>
    %16 = vector.broadcast %15 : vector<1x16xf32> to vector<16x16xf32>
    %17 = arith.subf %11, %16 : vector<16x16xf32>
    %18 = arith.mulf %17, %17 : vector<16x16xf32>
    %cst_14 = arith.constant dense<0.000000e+00> : vector<16xf32>
    %19 = vector.multi_reduction <add>, %18, %cst_14 [0] : vector<16x16xf32> to vector<16xf32>
    %20 = vector.shape_cast %19 : vector<16xf32> to vector<1x16xf32>
    %cst_15 = arith.constant 6.250000e-02 : f32
    %21 = vector.broadcast %cst_15 : f32 to vector<1x16xf32>
    %22 = arith.mulf %20, %21 : vector<1x16xf32>
    %cst_16 = arith.constant 9.99999974E-6 : f32
    %23 = vector.broadcast %cst_16 : f32 to vector<1x16xf32>
    %24 = arith.addf %22, %23 : vector<1x16xf32>
    %25 = math.rsqrt %24 : vector<1x16xf32>
    %26 = vector.broadcast %25 : vector<1x16xf32> to vector<16x16xf32>
    %27 = arith.mulf %17, %26 : vector<16x16xf32>
    %cst_17 = arith.constant 0.000000e+00 : f32
    %28 = vector.broadcast %cst_17 : f32 to vector<16x16xf32>
    %29 = arith.cmpf oge, %27, %28 : vector<16x16xf32>
    %cst_18 = arith.constant 0.00999999977 : f32
    %30 = vector.broadcast %cst_18 : f32 to vector<16x16xf32>
    %31 = arith.mulf %30, %27 : vector<16x16xf32>
    %32 = arith.select %29, %27, %31 : vector<16x16xi1>, vector<16x16xf32>
    %c0_19 = arith.constant 0 : index
    %c0_20 = arith.constant 0 : index
    %c0_21 = arith.constant 0 : index
    %33 = vector.load %arg6[%c0_19, %c0_20, %c0_21] : memref<2x16x16xf32, #tpu.memory_space<vmem>>, vector<1x16x16xf32>
    %34 = vector.shape_cast %33 : vector<1x16x16xf32> to vector<16x16xf32>
    %35 = vector.shape_cast %32 : vector<16x16xf32> to vector<1x16x16xf32>
    tpu.vector_store %arg6[%c0_19, %c0_20, %c0_21], %35 {strides = array<i32>} : memref<2x16x16xf32, #tpu.memory_space<vmem>>, vector<1x16x16xf32>,
    %c1 = arith.constant 1 : index
    %c0_22 = arith.constant 0 : index
    %c0_23 = arith.constant 0 : index
    %36 = vector.load %arg1[%c1, %c0_22, %c0_23] : memref<2x16x32xf32, #tpu.memory_space<vmem>>, vector<1x16x32xf32>
    %37 = vector.shape_cast %36 : vector<1x16x32xf32> to vector<16x32xf32>
    %cst_24 = arith.constant dense<0.000000e+00> : vector<16x16xf32>
    %38 = tpu.matmul %37, %0, %cst_24 {dimension_numbers = #tpu.dot_dimension_numbers<[1], [0], [0], [1], [0, 0, 1, 1], [], []>} : vector<16x32xf32>, vector<32x16xf32>, vector<16x16xf32> -> vector<16x16xf32>
    %c1_25 = arith.constant 1 : index
    %c0_26 = arith.constant 0 : index
    %c0_27 = arith.constant 0 : index
    %39 = vector.load %arg2[%c1_25, %c0_26, %c0_27] : memref<2x16x160xf32, #tpu.memory_space<vmem>>, vector<1x16x160xf32>
    %40 = vector.shape_cast %39 : vector<1x16x160xf32> to vector<16x160xf32>
    %cst_28 = arith.constant dense<0.000000e+00> : vector<16x16xf32>
    %41 = tpu.matmul %40, %1, %cst_28 {dimension_numbers = #tpu.dot_dimension_numbers<[1], [0], [0], [1], [0, 0, 1, 1], [], []>} : vector<16x160xf32>, vector<160x16xf32>, vector<16x16xf32> -> vector<16x16xf32>
    %42 = arith.addf %38, %41 : vector<16x16xf32>
    %43 = vector.broadcast %2 : vector<1x16xf32> to vector<16x16xf32>
    %44 = arith.addf %42, %43 : vector<16x16xf32>
    %cst_29 = arith.constant dense<0.000000e+00> : vector<16xf32>
    %45 = vector.multi_reduction <add>, %44, %cst_29 [0] : vector<16x16xf32> to vector<16xf32>
    %46 = vector.shape_cast %45 : vector<16xf32> to vector<1x16xf32>
    %cst_30 = arith.constant 6.250000e-02 : f32
    %47 = vector.broadcast %cst_30 : f32 to vector<1x16xf32>
    %48 = arith.mulf %46, %47 : vector<1x16xf32>
    %49 = vector.broadcast %48 : vector<1x16xf32> to vector<16x16xf32>
    %50 = arith.subf %44, %49 : vector<16x16xf32>
    %51 = arith.mulf %50, %50 : vector<16x16xf32>
    %cst_31 = arith.constant dense<0.000000e+00> : vector<16xf32>
    %52 = vector.multi_reduction <add>, %51, %cst_31 [0] : vector<16x16xf32> to vector<16xf32>
    %53 = vector.shape_cast %52 : vector<16xf32> to vector<1x16xf32>
    %cst_32 = arith.constant 6.250000e-02 : f32
    %54 = vector.broadcast %cst_32 : f32 to vector<1x16xf32>
    %55 = arith.mulf %53, %54 : vector<1x16xf32>
    %cst_33 = arith.constant 9.99999974E-6 : f32
    %56 = vector.broadcast %cst_33 : f32 to vector<1x16xf32>
    %57 = arith.addf %55, %56 : vector<1x16xf32>
    %58 = math.rsqrt %57 : vector<1x16xf32>
    %59 = vector.broadcast %58 : vector<1x16xf32> to vector<16x16xf32>
    %60 = arith.mulf %50, %59 : vector<16x16xf32>
    %cst_34 = arith.constant 0.000000e+00 : f32
    %61 = vector.broadcast %cst_34 : f32 to vector<16x16xf32>
    %62 = arith.cmpf oge, %60, %61 : vector<16x16xf32>
    %cst_35 = arith.constant 0.00999999977 : f32
    %63 = vector.broadcast %cst_35 : f32 to vector<16x16xf32>
    %64 = arith.mulf %63, %60 : vector<16x16xf32>
    %65 = arith.select %62, %60, %64 : vector<16x16xi1>, vector<16x16xf32>
    %c1_36 = arith.constant 1 : index
    %c0_37 = arith.constant 0 : index
    %c0_38 = arith.constant 0 : index
    %66 = vector.load %arg6[%c1_36, %c0_37, %c0_38] : memref<2x16x16xf32, #tpu.memory_space<vmem>>, vector<1x16x16xf32>
    %67 = vector.shape_cast %66 : vector<1x16x16xf32> to vector<16x16xf32>
    %68 = vector.shape_cast %65 : vector<16x16xf32> to vector<1x16x16xf32>
    tpu.vector_store %arg6[%c1_36, %c0_37, %c0_38], %68 {strides = array<i32>} : memref<2x16x16xf32, #tpu.memory_space<vmem>>, vector<1x16x16xf32>,
    return
  }
  func.func @transform_0(%arg0: i32) -> (i32, i32, i32) {
    %c0_i32 = arith.constant 0 : i32
    %c0_i32_0 = arith.constant 0 : i32
    %c0_i32_1 = arith.constant 0 : i32
    return %arg0, %c0_i32, %c0_i32_0 : i32, i32, i32
  }
  func.func @transform_1(%arg0: i32) -> (i32, i32, i32) {
    %c0_i32 = arith.constant 0 : i32
    %c0_i32_0 = arith.constant 0 : i32
    %c0_i32_1 = arith.constant 0 : i32
    return %arg0, %c0_i32, %c0_i32_0 : i32, i32, i32
  }
  func.func @transform_2(%arg0: i32) -> (i32, i32) {
    %c0_i32 = arith.constant 0 : i32
    %c0_i32_0 = arith.constant 0 : i32
    %c0_i32_1 = arith.constant 0 : i32
    return %c0_i32, %c0_i32_0 : i32, i32
  }
  func.func @transform_3(%arg0: i32) -> (i32, i32) {
    %c0_i32 = arith.constant 0 : i32
    %c0_i32_0 = arith.constant 0 : i32
    %c0_i32_1 = arith.constant 0 : i32
    return %c0_i32, %c0_i32_0 : i32, i32
  }
  func.func @transform_4(%arg0: i32) -> (i32, i32) {
    %c0_i32 = arith.constant 0 : i32
    %c0_i32_0 = arith.constant 0 : i32
    %c0_i32_1 = arith.constant 0 : i32
    return %c0_i32, %c0_i32_0 : i32, i32
  }
  func.func @transform_5(%arg0: i32) -> (i32, i32, i32) {
    %c0_i32 = arith.constant 0 : i32
    %c0_i32_0 = arith.constant 0 : i32
    %c0_i32_1 = arith.constant 0 : i32
    return %arg0, %c0_i32, %c0_i32_0 : i32, i32, i32
  }
}

module attributes {stable_mosaic.version = 11 : i64} {
  func.func @stage2_kernel(%arg0: i32, %arg1: memref<2x16x16xf32, #tpu.memory_space<vmem>>, %arg2: memref<2x16x80xf32, #tpu.memory_space<vmem>>, %arg3: memref<2x16x32xf32, #tpu.memory_space<vmem>>, %arg4: memref<16x16xf32, #tpu.memory_space<vmem>>, %arg5: memref<80x16xf32, #tpu.memory_space<vmem>>, %arg6: memref<1x16xf32, #tpu.memory_space<vmem>>, %arg7: memref<32x16xf32, #tpu.memory_space<vmem>>, %arg8: memref<1x16xf32, #tpu.memory_space<vmem>>, %arg9: memref<1x16xf32, #tpu.memory_space<vmem>>, %arg10: memref<2x16x1xf32, #tpu.memory_space<vmem>>) attributes {dimension_semantics = [#tpu.dimension_semantics<parallel>], iteration_bounds = array<i64: 2>, scalar_prefetch = 0 : i64, scratch_operands = 0 : i64, tpu.core_type = #tpu.core_type<tc>, window_params = [{transform_indices = @transform_0, window_bounds = array<i64: 2, 16, 16>}, {transform_indices = @transform_1, window_bounds = array<i64: 2, 16, 80>}, {transform_indices = @transform_2, window_bounds = array<i64: 2, 16, 32>}, {pipeline_mode = #tpu.pipeline_mode<synchronous>, transform_indices = @transform_3, window_bounds = array<i64: 16, 16>}, {pipeline_mode = #tpu.pipeline_mode<synchronous>, transform_indices = @transform_4, window_bounds = array<i64: 80, 16>}, {pipeline_mode = #tpu.pipeline_mode<synchronous>, transform_indices = @transform_5, window_bounds = array<i64: 1, 16>}, {pipeline_mode = #tpu.pipeline_mode<synchronous>, transform_indices = @transform_6, window_bounds = array<i64: 32, 16>}, {pipeline_mode = #tpu.pipeline_mode<synchronous>, transform_indices = @transform_7, window_bounds = array<i64: 1, 16>}, {pipeline_mode = #tpu.pipeline_mode<synchronous>, transform_indices = @transform_8, window_bounds = array<i64: 1, 16>}, {transform_indices = @transform_9, window_bounds = array<i64: 2, 16, 1>}]} {
    %c0 = arith.constant 0 : index
    %c0_0 = arith.constant 0 : index
    %0 = vector.load %arg4[%c0, %c0_0] : memref<16x16xf32, #tpu.memory_space<vmem>>, vector<16x16xf32>
    %c0_1 = arith.constant 0 : index
    %c0_2 = arith.constant 0 : index
    %1 = vector.load %arg5[%c0_1, %c0_2] : memref<80x16xf32, #tpu.memory_space<vmem>>, vector<80x16xf32>
    %c0_3 = arith.constant 0 : index
    %c0_4 = arith.constant 0 : index
    %2 = vector.load %arg6[%c0_3, %c0_4] : memref<1x16xf32, #tpu.memory_space<vmem>>, vector<1x16xf32>
    %c0_5 = arith.constant 0 : index
    %c0_6 = arith.constant 0 : index
    %3 = vector.load %arg7[%c0_5, %c0_6] : memref<32x16xf32, #tpu.memory_space<vmem>>, vector<32x16xf32>
    %c0_7 = arith.constant 0 : index
    %c0_8 = arith.constant 0 : index
    %4 = vector.load %arg8[%c0_7, %c0_8] : memref<1x16xf32, #tpu.memory_space<vmem>>, vector<1x16xf32>
    %c0_9 = arith.constant 0 : index
    %c0_10 = arith.constant 0 : index
    %5 = vector.load %arg9[%c0_9, %c0_10] : memref<1x16xf32, #tpu.memory_space<vmem>>, vector<1x16xf32>
    %c0_11 = arith.constant 0 : index
    %c0_12 = arith.constant 0 : index
    %c0_13 = arith.constant 0 : index
    %6 = vector.load %arg1[%c0_11, %c0_12, %c0_13] : memref<2x16x16xf32, #tpu.memory_space<vmem>>, vector<1x16x16xf32>
    %7 = vector.shape_cast %6 : vector<1x16x16xf32> to vector<16x16xf32>
    %cst = arith.constant dense<0.000000e+00> : vector<16x16xf32>
    %8 = tpu.matmul %7, %0, %cst {dimension_numbers = #tpu.dot_dimension_numbers<[1], [0], [0], [1], [0, 0, 1, 1], [], []>} : vector<16x16xf32>, vector<16x16xf32>, vector<16x16xf32> -> vector<16x16xf32>
    %c0_14 = arith.constant 0 : index
    %c0_15 = arith.constant 0 : index
    %c0_16 = arith.constant 0 : index
    %9 = vector.load %arg2[%c0_14, %c0_15, %c0_16] : memref<2x16x80xf32, #tpu.memory_space<vmem>>, vector<1x16x80xf32>
    %10 = vector.shape_cast %9 : vector<1x16x80xf32> to vector<16x80xf32>
    %cst_17 = arith.constant dense<0.000000e+00> : vector<16x16xf32>
    %11 = tpu.matmul %10, %1, %cst_17 {dimension_numbers = #tpu.dot_dimension_numbers<[1], [0], [0], [1], [0, 0, 1, 1], [], []>} : vector<16x80xf32>, vector<80x16xf32>, vector<16x16xf32> -> vector<16x16xf32>
    %12 = arith.addf %8, %11 : vector<16x16xf32>
    %13 = vector.broadcast %2 : vector<1x16xf32> to vector<16x16xf32>
    %14 = arith.addf %12, %13 : vector<16x16xf32>
    %cst_18 = arith.constant dense<0.000000e+00> : vector<16xf32>
    %15 = vector.multi_reduction <add>, %14, %cst_18 [0] : vector<16x16xf32> to vector<16xf32>
    %16 = vector.shape_cast %15 : vector<16xf32> to vector<1x16xf32>
    %cst_19 = arith.constant 6.250000e-02 : f32
    %17 = vector.broadcast %cst_19 : f32 to vector<1x16xf32>
    %18 = arith.mulf %16, %17 : vector<1x16xf32>
    %19 = vector.broadcast %18 : vector<1x16xf32> to vector<16x16xf32>
    %20 = arith.subf %14, %19 : vector<16x16xf32>
    %21 = arith.mulf %20, %20 : vector<16x16xf32>
    %cst_20 = arith.constant dense<0.000000e+00> : vector<16xf32>
    %22 = vector.multi_reduction <add>, %21, %cst_20 [0] : vector<16x16xf32> to vector<16xf32>
    %23 = vector.shape_cast %22 : vector<16xf32> to vector<1x16xf32>
    %cst_21 = arith.constant 6.250000e-02 : f32
    %24 = vector.broadcast %cst_21 : f32 to vector<1x16xf32>
    %25 = arith.mulf %23, %24 : vector<1x16xf32>
    %cst_22 = arith.constant 9.99999974E-6 : f32
    %26 = vector.broadcast %cst_22 : f32 to vector<1x16xf32>
    %27 = arith.addf %25, %26 : vector<1x16xf32>
    %28 = math.rsqrt %27 : vector<1x16xf32>
    %29 = vector.broadcast %28 : vector<1x16xf32> to vector<16x16xf32>
    %30 = arith.mulf %20, %29 : vector<16x16xf32>
    %c0_23 = arith.constant 0 : index
    %c0_24 = arith.constant 0 : index
    %c0_25 = arith.constant 0 : index
    %31 = vector.load %arg3[%c0_23, %c0_24, %c0_25] : memref<2x16x32xf32, #tpu.memory_space<vmem>>, vector<1x16x32xf32>
    %32 = vector.shape_cast %31 : vector<1x16x32xf32> to vector<16x32xf32>
    %cst_26 = arith.constant dense<0.000000e+00> : vector<16x16xf32>
    %33 = tpu.matmul %32, %3, %cst_26 {dimension_numbers = #tpu.dot_dimension_numbers<[1], [0], [0], [1], [0, 0, 1, 1], [], []>} : vector<16x32xf32>, vector<32x16xf32>, vector<16x16xf32> -> vector<16x16xf32>
    %34 = vector.broadcast %4 : vector<1x16xf32> to vector<16x16xf32>
    %35 = arith.addf %33, %34 : vector<16x16xf32>
    %cst_27 = arith.constant dense<0.000000e+00> : vector<16xf32>
    %36 = vector.multi_reduction <add>, %35, %cst_27 [0] : vector<16x16xf32> to vector<16xf32>
    %37 = vector.shape_cast %36 : vector<16xf32> to vector<1x16xf32>
    %cst_28 = arith.constant 6.250000e-02 : f32
    %38 = vector.broadcast %cst_28 : f32 to vector<1x16xf32>
    %39 = arith.mulf %37, %38 : vector<1x16xf32>
    %40 = vector.broadcast %39 : vector<1x16xf32> to vector<16x16xf32>
    %41 = arith.subf %35, %40 : vector<16x16xf32>
    %42 = arith.mulf %41, %41 : vector<16x16xf32>
    %cst_29 = arith.constant dense<0.000000e+00> : vector<16xf32>
    %43 = vector.multi_reduction <add>, %42, %cst_29 [0] : vector<16x16xf32> to vector<16xf32>
    %44 = vector.shape_cast %43 : vector<16xf32> to vector<1x16xf32>
    %cst_30 = arith.constant 6.250000e-02 : f32
    %45 = vector.broadcast %cst_30 : f32 to vector<1x16xf32>
    %46 = arith.mulf %44, %45 : vector<1x16xf32>
    %cst_31 = arith.constant 9.99999974E-6 : f32
    %47 = vector.broadcast %cst_31 : f32 to vector<1x16xf32>
    %48 = arith.addf %46, %47 : vector<1x16xf32>
    %49 = math.rsqrt %48 : vector<1x16xf32>
    %50 = vector.broadcast %49 : vector<1x16xf32> to vector<16x16xf32>
    %51 = arith.mulf %41, %50 : vector<16x16xf32>
    %52 = arith.addf %30, %51 : vector<16x16xf32>
    %cst_32 = arith.constant 0.000000e+00 : f32
    %53 = vector.broadcast %cst_32 : f32 to vector<16x16xf32>
    %54 = arith.cmpf oge, %52, %53 : vector<16x16xf32>
    %cst_33 = arith.constant 0.00999999977 : f32
    %55 = vector.broadcast %cst_33 : f32 to vector<16x16xf32>
    %56 = arith.mulf %55, %52 : vector<16x16xf32>
    %57 = arith.select %54, %52, %56 : vector<16x16xi1>, vector<16x16xf32>
    %58 = vector.broadcast %5 : vector<1x16xf32> to vector<16x16xf32>
    %59 = arith.mulf %57, %58 : vector<16x16xf32>
    %cst_34 = arith.constant dense<0.000000e+00> : vector<16xf32>
    %60 = vector.multi_reduction <add>, %59, %cst_34 [1] : vector<16x16xf32> to vector<16xf32>
    %61 = vector.shape_cast %60 : vector<16xf32> to vector<16x1xf32>
    %c0_35 = arith.constant 0 : index
    %c0_36 = arith.constant 0 : index
    %c0_37 = arith.constant 0 : index
    %62 = vector.load %arg10[%c0_35, %c0_36, %c0_37] : memref<2x16x1xf32, #tpu.memory_space<vmem>>, vector<1x16x1xf32>
    %63 = vector.shape_cast %62 : vector<1x16x1xf32> to vector<16x1xf32>
    %64 = vector.shape_cast %61 : vector<16x1xf32> to vector<1x16x1xf32>
    tpu.vector_store %arg10[%c0_35, %c0_36, %c0_37], %64 {strides = array<i32>} : memref<2x16x1xf32, #tpu.memory_space<vmem>>, vector<1x16x1xf32>,
    %c1 = arith.constant 1 : index
    %c0_38 = arith.constant 0 : index
    %c0_39 = arith.constant 0 : index
    %65 = vector.load %arg1[%c1, %c0_38, %c0_39] : memref<2x16x16xf32, #tpu.memory_space<vmem>>, vector<1x16x16xf32>
    %66 = vector.shape_cast %65 : vector<1x16x16xf32> to vector<16x16xf32>
    %cst_40 = arith.constant dense<0.000000e+00> : vector<16x16xf32>
    %67 = tpu.matmul %66, %0, %cst_40 {dimension_numbers = #tpu.dot_dimension_numbers<[1], [0], [0], [1], [0, 0, 1, 1], [], []>} : vector<16x16xf32>, vector<16x16xf32>, vector<16x16xf32> -> vector<16x16xf32>
    %c1_41 = arith.constant 1 : index
    %c0_42 = arith.constant 0 : index
    %c0_43 = arith.constant 0 : index
    %68 = vector.load %arg2[%c1_41, %c0_42, %c0_43] : memref<2x16x80xf32, #tpu.memory_space<vmem>>, vector<1x16x80xf32>
    %69 = vector.shape_cast %68 : vector<1x16x80xf32> to vector<16x80xf32>
    %cst_44 = arith.constant dense<0.000000e+00> : vector<16x16xf32>
    %70 = tpu.matmul %69, %1, %cst_44 {dimension_numbers = #tpu.dot_dimension_numbers<[1], [0], [0], [1], [0, 0, 1, 1], [], []>} : vector<16x80xf32>, vector<80x16xf32>, vector<16x16xf32> -> vector<16x16xf32>
    %71 = arith.addf %67, %70 : vector<16x16xf32>
    %72 = vector.broadcast %2 : vector<1x16xf32> to vector<16x16xf32>
    %73 = arith.addf %71, %72 : vector<16x16xf32>
    %cst_45 = arith.constant dense<0.000000e+00> : vector<16xf32>
    %74 = vector.multi_reduction <add>, %73, %cst_45 [0] : vector<16x16xf32> to vector<16xf32>
    %75 = vector.shape_cast %74 : vector<16xf32> to vector<1x16xf32>
    %cst_46 = arith.constant 6.250000e-02 : f32
    %76 = vector.broadcast %cst_46 : f32 to vector<1x16xf32>
    %77 = arith.mulf %75, %76 : vector<1x16xf32>
    %78 = vector.broadcast %77 : vector<1x16xf32> to vector<16x16xf32>
    %79 = arith.subf %73, %78 : vector<16x16xf32>
    %80 = arith.mulf %79, %79 : vector<16x16xf32>
    %cst_47 = arith.constant dense<0.000000e+00> : vector<16xf32>
    %81 = vector.multi_reduction <add>, %80, %cst_47 [0] : vector<16x16xf32> to vector<16xf32>
    %82 = vector.shape_cast %81 : vector<16xf32> to vector<1x16xf32>
    %cst_48 = arith.constant 6.250000e-02 : f32
    %83 = vector.broadcast %cst_48 : f32 to vector<1x16xf32>
    %84 = arith.mulf %82, %83 : vector<1x16xf32>
    %cst_49 = arith.constant 9.99999974E-6 : f32
    %85 = vector.broadcast %cst_49 : f32 to vector<1x16xf32>
    %86 = arith.addf %84, %85 : vector<1x16xf32>
    %87 = math.rsqrt %86 : vector<1x16xf32>
    %88 = vector.broadcast %87 : vector<1x16xf32> to vector<16x16xf32>
    %89 = arith.mulf %79, %88 : vector<16x16xf32>
    %c1_50 = arith.constant 1 : index
    %c0_51 = arith.constant 0 : index
    %c0_52 = arith.constant 0 : index
    %90 = vector.load %arg3[%c1_50, %c0_51, %c0_52] : memref<2x16x32xf32, #tpu.memory_space<vmem>>, vector<1x16x32xf32>
    %91 = vector.shape_cast %90 : vector<1x16x32xf32> to vector<16x32xf32>
    %cst_53 = arith.constant dense<0.000000e+00> : vector<16x16xf32>
    %92 = tpu.matmul %91, %3, %cst_53 {dimension_numbers = #tpu.dot_dimension_numbers<[1], [0], [0], [1], [0, 0, 1, 1], [], []>} : vector<16x32xf32>, vector<32x16xf32>, vector<16x16xf32> -> vector<16x16xf32>
    %93 = vector.broadcast %4 : vector<1x16xf32> to vector<16x16xf32>
    %94 = arith.addf %92, %93 : vector<16x16xf32>
    %cst_54 = arith.constant dense<0.000000e+00> : vector<16xf32>
    %95 = vector.multi_reduction <add>, %94, %cst_54 [0] : vector<16x16xf32> to vector<16xf32>
    %96 = vector.shape_cast %95 : vector<16xf32> to vector<1x16xf32>
    %cst_55 = arith.constant 6.250000e-02 : f32
    %97 = vector.broadcast %cst_55 : f32 to vector<1x16xf32>
    %98 = arith.mulf %96, %97 : vector<1x16xf32>
    %99 = vector.broadcast %98 : vector<1x16xf32> to vector<16x16xf32>
    %100 = arith.subf %94, %99 : vector<16x16xf32>
    %101 = arith.mulf %100, %100 : vector<16x16xf32>
    %cst_56 = arith.constant dense<0.000000e+00> : vector<16xf32>
    %102 = vector.multi_reduction <add>, %101, %cst_56 [0] : vector<16x16xf32> to vector<16xf32>
    %103 = vector.shape_cast %102 : vector<16xf32> to vector<1x16xf32>
    %cst_57 = arith.constant 6.250000e-02 : f32
    %104 = vector.broadcast %cst_57 : f32 to vector<1x16xf32>
    %105 = arith.mulf %103, %104 : vector<1x16xf32>
    %cst_58 = arith.constant 9.99999974E-6 : f32
    %106 = vector.broadcast %cst_58 : f32 to vector<1x16xf32>
    %107 = arith.addf %105, %106 : vector<1x16xf32>
    %108 = math.rsqrt %107 : vector<1x16xf32>
    %109 = vector.broadcast %108 : vector<1x16xf32> to vector<16x16xf32>
    %110 = arith.mulf %100, %109 : vector<16x16xf32>
    %111 = arith.addf %89, %110 : vector<16x16xf32>
    %cst_59 = arith.constant 0.000000e+00 : f32
    %112 = vector.broadcast %cst_59 : f32 to vector<16x16xf32>
    %113 = arith.cmpf oge, %111, %112 : vector<16x16xf32>
    %cst_60 = arith.constant 0.00999999977 : f32
    %114 = vector.broadcast %cst_60 : f32 to vector<16x16xf32>
    %115 = arith.mulf %114, %111 : vector<16x16xf32>
    %116 = arith.select %113, %111, %115 : vector<16x16xi1>, vector<16x16xf32>
    %117 = vector.broadcast %5 : vector<1x16xf32> to vector<16x16xf32>
    %118 = arith.mulf %116, %117 : vector<16x16xf32>
    %cst_61 = arith.constant dense<0.000000e+00> : vector<16xf32>
    %119 = vector.multi_reduction <add>, %118, %cst_61 [1] : vector<16x16xf32> to vector<16xf32>
    %120 = vector.shape_cast %119 : vector<16xf32> to vector<16x1xf32>
    %c1_62 = arith.constant 1 : index
    %c0_63 = arith.constant 0 : index
    %c0_64 = arith.constant 0 : index
    %121 = vector.load %arg10[%c1_62, %c0_63, %c0_64] : memref<2x16x1xf32, #tpu.memory_space<vmem>>, vector<1x16x1xf32>
    %122 = vector.shape_cast %121 : vector<1x16x1xf32> to vector<16x1xf32>
    %123 = vector.shape_cast %120 : vector<16x1xf32> to vector<1x16x1xf32>
    tpu.vector_store %arg10[%c1_62, %c0_63, %c0_64], %123 {strides = array<i32>} : memref<2x16x1xf32, #tpu.memory_space<vmem>>, vector<1x16x1xf32>,
    return
  }
  func.func @transform_0(%arg0: i32) -> (i32, i32, i32) {
    %c0_i32 = arith.constant 0 : i32
    %c0_i32_0 = arith.constant 0 : i32
    %c0_i32_1 = arith.constant 0 : i32
    return %arg0, %c0_i32, %c0_i32_0 : i32, i32, i32
  }
  func.func @transform_1(%arg0: i32) -> (i32, i32, i32) {
    %c0_i32 = arith.constant 0 : i32
    %c0_i32_0 = arith.constant 0 : i32
    %c0_i32_1 = arith.constant 0 : i32
    return %arg0, %c0_i32, %c0_i32_0 : i32, i32, i32
  }
  func.func @transform_2(%arg0: i32) -> (i32, i32, i32) {
    %c0_i32 = arith.constant 0 : i32
    %c0_i32_0 = arith.constant 0 : i32
    %c0_i32_1 = arith.constant 0 : i32
    return %arg0, %c0_i32, %c0_i32_0 : i32, i32, i32
  }
  func.func @transform_3(%arg0: i32) -> (i32, i32) {
    %c0_i32 = arith.constant 0 : i32
    %c0_i32_0 = arith.constant 0 : i32
    %c0_i32_1 = arith.constant 0 : i32
    return %c0_i32, %c0_i32_0 : i32, i32
  }
  func.func @transform_4(%arg0: i32) -> (i32, i32) {
    %c0_i32 = arith.constant 0 : i32
    %c0_i32_0 = arith.constant 0 : i32
    %c0_i32_1 = arith.constant 0 : i32
    return %c0_i32, %c0_i32_0 : i32, i32
  }
  func.func @transform_5(%arg0: i32) -> (i32, i32) {
    %c0_i32 = arith.constant 0 : i32
    %c0_i32_0 = arith.constant 0 : i32
    %c0_i32_1 = arith.constant 0 : i32
    return %c0_i32, %c0_i32_0 : i32, i32
  }
  func.func @transform_6(%arg0: i32) -> (i32, i32) {
    %c0_i32 = arith.constant 0 : i32
    %c0_i32_0 = arith.constant 0 : i32
    %c0_i32_1 = arith.constant 0 : i32
    return %c0_i32, %c0_i32_0 : i32, i32
  }
  func.func @transform_7(%arg0: i32) -> (i32, i32) {
    %c0_i32 = arith.constant 0 : i32
    %c0_i32_0 = arith.constant 0 : i32
    %c0_i32_1 = arith.constant 0 : i32
    return %c0_i32, %c0_i32_0 : i32, i32
  }
  func.func @transform_8(%arg0: i32) -> (i32, i32) {
    %c0_i32 = arith.constant 0 : i32
    %c0_i32_0 = arith.constant 0 : i32
    %c0_i32_1 = arith.constant 0 : i32
    return %c0_i32, %c0_i32_0 : i32, i32
  }
  func.func @transform_9(%arg0: i32) -> (i32, i32, i32) {
    %c0_i32 = arith.constant 0 : i32
    %c0_i32_0 = arith.constant 0 : i32
    %c0_i32_1 = arith.constant 0 : i32
    return %arg0, %c0_i32, %c0_i32_0 : i32, i32, i32
  }
}

</mosaic_0001>

<bundles_post_ra>
// kernel: feature2delta.2
= control target key start
LH: loop header
LB: loop body
LE: loop exit
PB: predicated region body
PF: predicated region fallthrough
CT: control target
= control target key end

     0   :  { %s898_s18 = smov 0   ;;  %s1101_s0 = inlined_call_operand.vmem [shape: f32[4,16,32], index: 0, kind: input, shape index: {}]   ;;  %s1102_s1 = inlined_call_operand.vmem [shape: f32[4,16,160], index: 1, kind: input, shape index: {}]   ;;  %s1103_s2 = inlined_call_operand.vmem [shape: f32[32,16], index: 2, kind: input, shape index: {}]   ;;  %s1104_s3 = inlined_call_operand.vmem [shape: f32[160,16], index: 3, kind: input, shape index: {}]   ;;  %s1105_s4 = inlined_call_operand.vmem [shape: f32[1,16], index: 4, kind: input, shape index: {}]   ;;  %s1106_s5 = inlined_call_operand.vmem [shape: f32[4,16,16], index: 5, kind: output, shape index: {}]  }
   0x1 LB: > { %s776_s19 = sadd.s32 4294967295, %s865_s18   ;;  %p780_p0 = scmp.ge.s32.totalorder %s865_s18, 1  ;;  %s865_s18 = sphi %s898_s18, %s15_s18  }
   0x2   : > { %p201_p1 = scmp.lt.s32.totalorder %s865_s18, 3 }
   0x4   : > { %p202_p2 = pnand %p780_p0, %p201_p1 }
   0x5   : > { %s781_s26 = sshll.u32 (!%p202_p2), %s776_s19, 1 }
   0x6   : > { %205 = sbr.rel (%p202_p2) target bundleno = 325 (0x145), region = 40  ;;  %p238_p3 = scmp.lt.s32.totalorder (!%p202_p2), %s781_s26, 3 }
   0xb   : > { %v909_v0 = vld [vmem:[%s1103_s2 + $0x18] sm:$0xff]  ;;  %v917_v2 = vld [vmem:[%s1103_s2 + $0x10] sm:$0xff]  ;;  %v867_v3 = vmov 0.0   ;;  %v928_v5 = vld [vmem:[%s1103_s2 + $0x8] sm:$0xff]  ;;  %s1108_s26 = smov (!%p238_p3, %s781_s26), 3  ;;  %vm289_vm0 = vcmask 261120  }
   0xc   : > { %v277_v1 = vld [vmem:[%s1104_s3 + $0x78] sm:$0xff]  ;;  %296 = vmatprep.subr.mxu0 %v867_v3  ;;  %824 = vmatprep.subr.mxu1 %v909_v0  ;;  %v276_v4 = vld [vmem:[%s1104_s3 + $0x70] sm:$0xff]  ;;  %v275_v6 = vld [vmem:[%s1104_s3 + $0x68] sm:$0xff]  ;;  %s809_s12 = sshll.u32 %s1108_s26, 4  ;;  %s810_s20 = sshll.u32 %s1108_s26, 5  ;;  %vm460_vm1 = vcmask 130048  }
   0xd   : > { %297 = vmatpush1.msra.mxu0 %v277_v1  ;;  %825 = vmatpush3.msra.mxu1 %v909_v0  ;;  %v941_v7 = vld [vmem:[%s1103_s2] sm:$0xff]  ;;  %s955_s15 = scalar_lea.vmem %s1101_s0, %s809_s12  ;;  %v273_v11 = vld [vmem:[%s1104_s3 + $0x58] sm:$0xff]  ;;  %v272_v12 = vld [vmem:[%s1104_s3 + $0x50] sm:$0xff]  ;;  %s1036_s28 = scalar_lea.vmem %s1102_s1, %s810_s20 }
   0xe   : > { %298 = vmatprep.subr.mxu0 %v867_v3  ;;  %826 = vmatprep.subr.mxu1 %v917_v2  ;;  %v274_v8 = vld [vmem:[%s1104_s3 + $0x60] sm:$0xff]  ;;  %v284_v10 = vld [vmem:[%s955_s15 + $0x8] sm:$0xff]  ;;  %v269_v15 = vld [vmem:[%s1104_s3 + $0x38] sm:$0xff]  ;;  %s256_s11 = scalar_lea.vmem %s1106_s5, %s809_s12 }
   0xf   : > { %299 = vmatpush1.msra.mxu0 %v276_v4  ;;  %827 = vmatpush3.msra.mxu1 %v917_v2  ;;  %v283_v9 = vld [vmem:[%s955_s15] sm:$0xff]  ;;  %v271_v13 = vld [vmem:[%s1104_s3 + $0x48] sm:$0xff]  ;;  %v268_v16 = vld [vmem:[%s1104_s3 + $0x30] sm:$0xff] }
  0x10   : > { %300 = vmatprep.subr.mxu0 %v867_v3  ;;  %828 = vmatprep.subr.mxu1 %v928_v5  ;;  %v270_v14 = vld [vmem:[%s1104_s3 + $0x40] sm:$0xff]  ;;  %v267_v17 = vld [vmem:[%s1104_s3 + $0x28] sm:$0xff]  ;;  %v265_v19 = vld [vmem:[%s1104_s3 + $0x18] sm:$0xff] }
  0x11   : > { %301 = vmatpush1.msra.mxu0 %v275_v6  ;;  %829 = vmatpush3.msra.mxu1 %v928_v5  ;;  %v266_v18 = vld [vmem:[%s1104_s3 + $0x20] sm:$0xff]  ;;  %v264_v20 = vld [vmem:[%s1104_s3 + $0x10] sm:$0xff]  ;;  %v263_v21 = vld [vmem:[%s1104_s3 + $0x8] sm:$0xff] }
  0x12   : > { %302 = vmatprep.subr.mxu0 %v867_v3  ;;  %830 = vmatprep.subr.mxu1 %v941_v7  ;;  %v262_v22 = vld [vmem:[%s1104_s3] sm:$0xff]  ;;  %v281_v23 = vld [vmem:[%s1104_s3 + $0x98] sm:$0xff]  ;;  %v280_v24 = vld [vmem:[%s1104_s3 + $0x90] sm:$0xff] }
  0x13   : > { %303 = vmatpush1.msra.mxu0 %v274_v8  ;;  %831 = vmatpush3.msra.mxu1 %v941_v7  ;;  %v279_v25 = vld [vmem:[%s1104_s3 + $0x88] sm:$0xff]  ;;  %v278_v26 = vld [vmem:[%s1104_s3 + $0x80] sm:$0xff]  ;;  %v288_v29 = vld [vmem:[%s1036_s28 + $0x18] sm:$0xff] }
  0x14   : > { %832 = vmatprep.mubr.msk.f32.mxu1 %vm289_vm0, %v283_v9  ;;  %304 = vmatprep.subr.mxu0 %v867_v3  ;;  %v286_v27 = vld [vmem:[%s1036_s28 + $0x8] sm:$0xff]  ;;  %v285_v28 = vld [vmem:[%s1036_s28] sm:$0xff]  ;;  %v287_v30 = vld [vmem:[%s1036_s28 + $0x10] sm:$0xff] }
  0x15   : > { %833 = vmatmul.mubr.msk.f32.vlgmr.msra.gmra.mxu1 %vm289_vm0, %v284_v10  ;;  %511 = vmatprep.subr.mxu1 %v867_v3  ;;  %v798_v31 = vld [vmem:[%s1036_s28 + $0x28] sm:$0xff]  ;;  %v795_v32 = vld [vmem:[%s955_s15 + $0x10] sm:$0xff]  ;;  %v797_v33 = vld [vmem:[%s1036_s28 + $0x20] sm:$0xff] }
  0x16   : > { %305 = vmatpush1.msra.mxu0 %v273_v11  ;;  %512 = vmatpush1.msra.mxu1 %v277_v1  ;;  %v796_v34 = vld [vmem:[%s955_s15 + $0x18] sm:$0xff]  ;;  %v799_v36 = vld [vmem:[%s1036_s28 + $0x30] sm:$0xff]  ;;  %v794_v42 = vld [vmem:[%s1105_s4] ss:$0 sm:$0xff] }
  0x17   : > { %306 = vmatprep.subr.mxu0 %v867_v3  ;;  %513 = vmatprep.subr.mxu1 %v867_v3  ;;  %v800_v35 = vld [vmem:[%s1036_s28 + $0x38] sm:$0xff] }
  0x18   : > { %307 = vmatpush1.msra.mxu0 %v272_v12  ;;  %514 = vmatpush1.msra.mxu1 %v276_v4 }
  0x19   : > { %308 = vmatprep.subr.mxu0 %v867_v3  ;;  %515 = vmatprep.subr.mxu1 %v867_v3 }
  0x1a   : > { %309 = vmatpush1.msra.mxu0 %v271_v13  ;;  %516 = vmatpush1.msra.mxu1 %v275_v6 }
  0x1b   : > { %310 = vmatprep.subr.mxu0 %v867_v3  ;;  %517 = vmatprep.subr.mxu1 %v867_v3 }
  0x1c   : > { %311 = vmatpush1.msra.mxu0 %v270_v14  ;;  %518 = vmatpush1.msra.mxu1 %v274_v8 }
  0x1d   : > { %312 = vmatprep.subr.mxu0 %v867_v3  ;;  %519 = vmatprep.subr.mxu1 %v867_v3 }
  0x1e   : > { %313 = vmatpush1.msra.mxu0 %v269_v15  ;;  %520 = vmatpush1.msra.mxu1 %v273_v11 }
  0x1f   : > { %314 = vmatprep.subr.mxu0 %v867_v3  ;;  %521 = vmatprep.subr.mxu1 %v867_v3 }
  0x20   : > { %315 = vmatpush1.msra.mxu0 %v268_v16  ;;  %522 = vmatpush1.msra.mxu1 %v272_v12 }
  0x21   : > { %316 = vmatprep.subr.mxu0 %v867_v3  ;;  %523 = vmatprep.subr.mxu1 %v867_v3 }
  0x22   : > { %317 = vmatpush1.msra.mxu0 %v267_v17  ;;  %524 = vmatpush1.msra.mxu1 %v271_v13 }
  0x23   : > { %318 = vmatprep.subr.mxu0 %v867_v3  ;;  %525 = vmatprep.subr.mxu1 %v867_v3 }
  0x24   : > { %319 = vmatpush1.msra.mxu0 %v266_v18  ;;  %526 = vmatpush1.msra.mxu1 %v270_v14 }
  0x25   : > { %320 = vmatprep.subr.mxu0 %v867_v3  ;;  %527 = vmatprep.subr.mxu1 %v867_v3 }
  0x26   : > { %321 = vmatpush1.msra.mxu0 %v265_v19  ;;  %528 = vmatpush1.msra.mxu1 %v269_v15 }
  0x27   : > { %322 = vmatprep.subr.mxu0 %v867_v3  ;;  %529 = vmatprep.subr.mxu1 %v867_v3 }
  0x28   : > { %323 = vmatpush1.msra.mxu0 %v264_v20  ;;  %530 = vmatpush1.msra.mxu1 %v268_v16 }
  0x29   : > { %324 = vmatprep.subr.mxu0 %v867_v3  ;;  %531 = vmatprep.subr.mxu1 %v867_v3 }
  0x2a   : > { %325 = vmatpush1.msra.mxu0 %v263_v21  ;;  %532 = vmatpush1.msra.mxu1 %v267_v17 }
  0x2b   : > { %326 = vmatprep.subr.mxu0 %v867_v3  ;;  %533 = vmatprep.subr.mxu1 %v867_v3 }
  0x2c   : > { %327 = vmatpush1.msra.mxu0 %v262_v22  ;;  %534 = vmatpush1.msra.mxu1 %v266_v18 }
  0x2d   : > { %352 = vmatprep.subr.mxu0 %v867_v3  ;;  %535 = vmatprep.subr.mxu1 %v867_v3 }
  0x2e   : > { %353 = vmatpush2.msra.mxu0 %v281_v23  ;;  %536 = vmatpush1.msra.mxu1 %v265_v19 }
  0x2f   : > { %354 = vmatprep.subr.mxu0 %v867_v3  ;;  %537 = vmatprep.subr.mxu1 %v867_v3 }
  0x30   : > { %355 = vmatpush2.msra.mxu0 %v280_v24  ;;  %538 = vmatpush1.msra.mxu1 %v264_v20 }
  0x31   : > { %356 = vmatprep.subr.mxu0 %v867_v3  ;;  %539 = vmatprep.subr.mxu1 %v867_v3 }
  0x32   : > { %357 = vmatpush2.msra.mxu0 %v279_v25  ;;  %540 = vmatpush1.msra.mxu1 %v263_v21 }
  0x33   : > { %358 = vmatprep.subr.mxu0 %v867_v3  ;;  %541 = vmatprep.subr.mxu1 %v867_v3 }
  0x34   : > { %359 = vmatpush2.msra.mxu0 %v278_v26  ;;  %790 = vmatprep.mubr.msk.f32.mxu0 %vm289_vm0, %v286_v27 }
  0x35   : > { %542 = vmatpush1.msra.mxu1 %v262_v22  ;;  %361 = vmatmul.mubr.f32.vlgmr.msra.gmra.mxu0 %v285_v28 }
  0x36   : > { %567 = vmatprep.subr.mxu1 %v867_v3  ;;  %835 = vmatprep.subr.mxu0 %v909_v0 }
  0x37   : > { %568 = vmatpush2.msra.mxu1 %v281_v23  ;;  %836 = vmatpush3.msra.mxu0 %v909_v0 }
  0x38   : > { %569 = vmatprep.subr.mxu1 %v867_v3  ;;  %837 = vmatprep.subr.mxu0 %v917_v2 }
  0x39   : > { %791 = vmatprep.mubr.msk.f32.mxu0 %vm289_vm0, %v288_v29  ;;  %570 = vmatpush2.msra.mxu1 %v280_v24 }
  0x3a   : > { %838 = vmatpush3.msra.mxu0 %v917_v2  ;;  %571 = vmatprep.subr.mxu1 %v867_v3 }
  0x3b   : > { %366 = vmatmul.mubr.f32.gmra.mxu0 %v287_v30  ;;  %839 = vmatprep.subr.mxu0 %v928_v5 }
  0x3c   : > { %572 = vmatpush2.msra.mxu1 %v279_v25  ;;  %840 = vmatpush3.msra.mxu0 %v928_v5 }
  0x3d   : > { %573 = vmatprep.subr.mxu1 %v867_v3  ;;  %841 = vmatprep.subr.mxu0 %v941_v7 }
  0x3e   : > { %574 = vmatpush2.msra.mxu1 %v278_v26  ;;  %801 = vmatprep.mubr.msk.f32.mxu1 %vm289_vm0, %v798_v31 }
  0x3f   : > { %842 = vmatpush3.msra.mxu0 %v941_v7  ;;  %843 = vmatprep.mubr.msk.f32.mxu0 %vm289_vm0, %v795_v32 }
  0x40   : > { %576 = vmatmul.mubr.f32.vlgmr.msra.gmra.mxu1 %v797_v33  ;;  %844 = vmatmul.mubr.msk.f32.vlgmr.msra.gmra.mxu0 %vm289_vm0, %v796_v34 }
  0x41   : > { %802 = vmatprep.mubr.msk.f32.mxu1 %vm289_vm0, %v800_v35 }
  0x44   : > { %581 = vmatmul.mubr.f32.gmra.mxu1 %v799_v36 }
  0xd5   : > { %v834_v37 = vpop.f32.mrf.mxu1 }
  0xd7   : > { %v443_v39 = vpop.f32.mrf.mxu1 }
  0xf5   : > { %v362_v38 = vpop.f32.mrf.mxu0 }
  0xf6   : > { %v444_v41 = vadd.f32 %v443_v39, %v362_v38 }
  0xf7   : > { %v364_v40 = vpop.f32.mrf.mxu0 }
  0xf8   : > { %v458_v44 = vadd.f32 %v794_v42, %v444_v41 }
  0xfa   : > { %v461_v48 = vsel %vm460_vm1, %v458_v44, 0.0 }
  0xfb   : > { %v367_v43 = vpop.f32.mrf.mxu0 }
  0xfc   : > { %v449_v45 = vadd.f32 %v834_v37, %v367_v43 }
  0xfd   : > { %v369_v46 = vpop.f32.mrf.mxu0 }
  0xfe   : > { %v459_v47 = vadd.f32 %v794_v42, %v449_v45 }
 0x100   : > { %v462_v49 = vsel %vm460_vm1, %v459_v47, 0.0  ;;  %v577_v50 = vpop.f32.mrf.mxu1  ;;  %v845_v51 = vpop.f32.mrf.mxu0 }
 0x101   : > { %v463_v52 = vadd.f32 %v462_v49, %v461_v48 }
 0x102   : > { %v579_v53 = vpop.f32.mrf.mxu1  ;;  %v658_v54 = vpop.f32.mrf.mxu0 }
 0x103   : > { %v464_v55 = vrot.slane %v463_v52, 4  ;;  %v659_v56 = vadd.f32 %v658_v54, %v577_v50 }
 0x104   : > { %v582_v57 = vpop.f32.mrf.mxu1 }
 0x105   : > { %v465_v58 = vadd.f32 %v464_v55, %v463_v52  ;;  %v667_v59 = vadd.f32 %v794_v42, %v659_v56  ;;  %v664_v60 = vadd.f32 %v845_v51, %v582_v57 }
 0x106   : > { %v584_v61 = vpop.f32.mrf.mxu1 }
 0x107   : > { %v466_v62 = vrot.slane %v465_v58, 2  ;;  %v668_v63 = vadd.f32 %v794_v42, %v664_v60  ;;  %v669_v1 = vsel %vm460_vm1, %v667_v59, 0.0 }
 0x109   : > { %v467_v0 = vadd.f32 %v466_v62, %v465_v58  ;;  %v670_v2 = vsel %vm460_vm1, %v668_v63, 0.0 }
 0x10a   : > { %v671_v3 = vadd.f32 %v670_v2, %v669_v1 }
 0x10b   : > { %v468_v4 = vrot.slane %v467_v0, 1 }
 0x10c   : > { %v672_v5 = vrot.slane %v671_v3, 4 }
 0x10d   : > { %v469_v6 = vadd.f32 %v468_v4, %v467_v0 }
 0x10e   : > { %v673_v7 = vadd.f32 %v672_v5, %v671_v3 }
 0x10f   : > { %v470_v8 = vmul.f32 0.0625, %v469_v6 }
 0x110   : > { %v674_v9 = vrot.slane %v673_v7, 2 }
 0x111   : > { %v471_v10 = vsub.f32 %v458_v44, %v470_v8  ;;  %v472_v11 = vsub.f32 %v459_v47, %v470_v8 }
 0x112   : > { %v675_v12 = vadd.f32 %v674_v9, %v673_v7 }
 0x113   : > { %v473_v13 = vmul.f32 %v471_v10, %v471_v10  ;;  %v474_v14 = vmul.f32 %v472_v11, %v472_v11 }
 0x114   : > { %v676_v15 = vrot.slane %v675_v12, 1 }
 0x115   : > { %v475_v16 = vsel %vm460_vm1, %v473_v13, 0.0  ;;  %v476_v17 = vsel %vm460_vm1, %v474_v14, 0.0 }
 0x116   : > { %v477_v18 = vadd.f32 %v476_v17, %v475_v16  ;;  %v677_v19 = vadd.f32 %v676_v15, %v675_v12 }
 0x118   : > { %v478_v20 = vrot.slane %v477_v18, 4  ;;  %v678_v21 = vmul.f32 0.0625, %v677_v19 }
 0x11a   : > { %v479_v22 = vadd.f32 %v478_v20, %v477_v18  ;;  %v679_v23 = vsub.f32 %v667_v59, %v678_v21  ;;  %v680_v24 = vsub.f32 %v668_v63, %v678_v21 }
 0x11c   : > { %v480_v25 = vrot.slane %v479_v22, 2  ;;  %v681_v26 = vmul.f32 %v679_v23, %v679_v23  ;;  %v682_v27 = vmul.f32 %v680_v24, %v680_v24 }
 0x11e   : > { %v481_v28 = vadd.f32 %v480_v25, %v479_v22  ;;  %v683_v29 = vsel %vm460_vm1, %v681_v26, 0.0  ;;  %v684_v30 = vsel %vm460_vm1, %v682_v27, 0.0 }
 0x11f   : > { %v685_v31 = vadd.f32 %v684_v30, %v683_v29 }
 0x120   : > { %v482_v32 = vrot.slane %v481_v28, 1 }
 0x121   : > { %v686_v33 = vrot.slane %v685_v31, 4 }
 0x122   : > { %v483_v34 = vadd.f32 %v482_v32, %v481_v28 }
 0x123   : > { %v687_v35 = vadd.f32 %v686_v33, %v685_v31 }
 0x124   : > { %v484_v36 = vmul.f32 0.0625, %v483_v34 }
 0x125   : > { %v688_v37 = vrot.slane %v687_v35, 2 }
 0x126   : > { %v485_v38 = vadd.f32 1e-05, %v484_v36 }
 0x127   : > { %v689_v39 = vadd.f32 %v688_v37, %v687_v35 }
 0x128   : > { %855 = vrsqrt.f32 %v485_v38 }
 0x129   : > { %v690_v40 = vrot.slane %v689_v39, 1 }
 0x12b   : > { %v691_v41 = vadd.f32 %v690_v40, %v689_v39 }
 0x12d   : > { %v692_v42 = vmul.f32 0.0625, %v691_v41 }
 0x12f   : > { %v693_v43 = vadd.f32 1e-05, %v692_v42 }
 0x131   : > { %857 = vrsqrt.f32 %v693_v43 }
 0x135   : > { %v856_v44 = vpop.eup %855 }
 0x136   : > { %v487_v45 = vmul.f32 %v856_v44, %v471_v10  ;;  %v488_v46 = vmul.f32 %v856_v44, %v472_v11 }
 0x138   : > { %vm489_vm2 = vcmp.ge.f32.partialorder %v487_v45, 0.0  ;;  %vm490_vm3 = vcmp.ge.f32.partialorder %v488_v46, 0.0  ;;  %v491_v47 = vmul.f32 0.01, %v487_v45  ;;  %v492_v48 = vmul.f32 0.01, %v488_v46 }
 0x13a   : > { %v493_v49 = vsel %vm489_vm2, %v487_v45, %v491_v47  ;;  %v494_v50 = vsel %vm490_vm3, %v488_v46, %v492_v48 }
 0x13b   : > { %495 = vst.msk [vmem:[%s256_s11] sm:$0xff] %vm460_vm1, %v493_v49  ;;  %496 = vst.msk [vmem:[%s256_s11 + $0x8] sm:$0xff] %vm460_vm1, %v494_v50 }
 0x13e   : > { %v858_v51 = vpop.eup %857 }
 0x13f   : > { %v695_v52 = vmul.f32 %v858_v51, %v679_v23  ;;  %v696_v53 = vmul.f32 %v858_v51, %v680_v24 }
 0x141   : > { %vm697_vm4 = vcmp.ge.f32.partialorder %v695_v52, 0.0  ;;  %vm698_vm5 = vcmp.ge.f32.partialorder %v696_v53, 0.0  ;;  %v699_v54 = vmul.f32 0.01, %v695_v52  ;;  %v700_v55 = vmul.f32 0.01, %v696_v53 }
 0x143   : > { %v701_v56 = vsel %vm697_vm4, %v695_v52, %v699_v54  ;;  %v702_v57 = vsel %vm698_vm5, %v696_v53, %v700_v55 }
 0x144   : > { %805 = vst.msk [vmem:[%s256_s11 + $0x10] sm:$0xff] %vm460_vm1, %v701_v56  ;;  %806 = vst.msk [vmem:[%s256_s11 + $0x18] sm:$0xff] %vm460_vm1, %v702_v57 }
 0x145 PF: > { %s15_s18 = sadd.s32 1, %s865_s18  }
 0x146   : > { %p12_p4 = scmp.ge.s32.totalorder %s15_s18, 4  }
 0x148   :  { %14 = sbr.rel (!%p12_p4) target bundleno = 1 (0x1), region = 76 }

// kernel: feature2delta.3
= control target key start
LH: loop header
LB: loop body
LE: loop exit
PB: predicated region body
PF: predicated region fallthrough
CT: control target
= control target key end

     0   :  { %s1414_s30 = smov 0   ;;  %s1616_s0 = inlined_call_operand.vmem [shape: f32[4,16,16], index: 0, kind: input, shape index: {}]   ;;  %s1617_s1 = inlined_call_operand.vmem [shape: f32[4,16,80], index: 1, kind: input, shape index: {}]   ;;  %s1618_s2 = inlined_call_operand.vmem [shape: f32[4,16,32], index: 2, kind: input, shape index: {}]   ;;  %s1619_s3 = inlined_call_operand.vmem [shape: f32[16,16], index: 3, kind: input, shape index: {}]   ;;  %s1620_s4 = inlined_call_operand.vmem [shape: f32[80,16], index: 4, kind: input, shape index: {}]   ;;  %s1621_s5 = inlined_call_operand.vmem [shape: f32[1,16], index: 5, kind: input, shape index: {}]   ;;  %s1622_s6 = inlined_call_operand.vmem [shape: f32[32,16], index: 6, kind: input, shape index: {}]   ;;  %s1623_s7 = inlined_call_operand.vmem [shape: f32[1,16], index: 7, kind: input, shape index: {}]   ;;  %s1624_s8 = inlined_call_operand.vmem [shape: f32[1,16], index: 8, kind: input, shape index: {}]   ;;  %s1625_s9 = inlined_call_operand.vmem [shape: f32[4,16,1], index: 9, kind: output, shape index: {}]  }
   0x1 LB: > { %s1168_s10 = sadd.s32 4294967295, %s1362_s30   ;;  %p1172_p0 = scmp.ge.s32.totalorder %s1362_s30, 1  ;;  %s1362_s30 = sphi %s1414_s30, %s19_s30  }
   0x2   : > { %p313_p1 = scmp.lt.s32.totalorder %s1362_s30, 3 }
   0x4   : > { %p314_p2 = pnand %p1172_p0, %p313_p1 }
   0x5   : > { %s1173_s17 = sshll.u32 (!%p314_p2), %s1168_s10, 1 }
   0x6   : > { %317 = sbr.rel (%p314_p2) target bundleno = 457 (0x1c9), region = 56  ;;  %p364_p3 = scmp.lt.s32.totalorder (!%p314_p2), %s1173_s17, 3 }
   0xb   : > { %v402_v0 = vld [vmem:[%s1620_s4 + $0x48] sm:$0xff]  ;;  %v1428_v1 = vld [vmem:[%s1620_s4 + $0x40] sm:$0xff]  ;;  %v1444_v4 = vld [vmem:[%s1620_s4 + $0x38] sm:$0xff]  ;;  %s1627_s17 = smov (!%p364_p3, %s1173_s17), 3  ;;  %vm496_vm0 = vcmask 130048   ;;  %vm622_vm1 = vcmask 261120  }
   0xc   : > { %v1433_v2 = vld [vmem:[%s1619_s3 + $0x8] sm:$0xff]  ;;  %1258 = vmatprep.subr.mxu0 %v402_v0  ;;  %v1439_v3 = vld [vmem:[%s1619_s3] sm:$0xff]  ;;  %v1450_v5 = vld [vmem:[%s1622_s6 + $0x18] sm:$0xff]  ;;  %s1460_s26 = sshll.u32 %s1627_s17, 4  ;;  %vm414_vm2 = vcmask 654336   ;;  %vm754_vm7 = vcmask 7168  }
   0xd   : > { %1281 = vmatprep.subr.mxu1 %v1433_v2  ;;  %1259 = vmatpush3.msra.mxu0 %v402_v0  ;;  %v399_v6 = vld [vmem:[%s1620_s4 + $0x30] sm:$0xff]  ;;  %s1468_s29 = scalar_lea.vmem %s1616_s0, %s1460_s26  ;;  %v398_v7 = vld [vmem:[%s1620_s4 + $0x28] sm:$0xff]  ;;  %v397_v11 = vld [vmem:[%s1620_s4 + $0x20] sm:$0xff]  ;;  %s1496_s22 = scalar_lea.vmem %s1618_s2, %s1460_s26 }
   0xe   : > { %1282 = vmatpush3.msra.mxu1 %v1433_v2  ;;  %1260 = vmatprep.subr.mxu0 %v1428_v1  ;;  %v410_v8 = vld [vmem:[%s1468_s29] sm:$0xff]  ;;  %v411_v9 = vld [vmem:[%s1468_s29 + $0x8] sm:$0xff]  ;;  %v1479_v10 = vld [vmem:[%s1622_s6 + $0x10] sm:$0xff]  ;;  %s1516_s13 = scalar_lea.vmem %s1617_s1, %s1460_s26  ;;  %s389_s23 = scalar_lea.vmem %s1625_s9, %s1460_s26 }
   0xf   : > { %1283 = vmatprep.subr.mxu1 %v1439_v3  ;;  %1261 = vmatpush3.msra.mxu0 %v1428_v1  ;;  %v405_v12 = vld [vmem:[%s1622_s6 + $0x8] sm:$0xff]  ;;  %v396_v13 = vld [vmem:[%s1620_s4 + $0x18] sm:$0xff]  ;;  %v404_v14 = vld [vmem:[%s1622_s6] sm:$0xff] }
  0x10   : > { %1284 = vmatpush3.msra.mxu1 %v1439_v3  ;;  %1262 = vmatprep.subr.mxu0 %v1444_v4  ;;  %v395_v15 = vld [vmem:[%s1620_s4 + $0x10] sm:$0xff]  ;;  %v614_v16 = vld [vmem:[%s1496_s22] sm:$0xff]  ;;  %v615_v17 = vld [vmem:[%s1496_s22 + $0x8] sm:$0xff] }
  0x11   : > { %1288 = vmatprep.subr.mxu1 %v1450_v5  ;;  %1263 = vmatpush3.msra.mxu0 %v1444_v4  ;;  %v394_v18 = vld [vmem:[%s1620_s4 + $0x8] sm:$0xff]  ;;  %v393_v19 = vld [vmem:[%s1620_s4] sm:$0xff]  ;;  %v1194_v22 = vld [vmem:[%s1468_s29 + $0x10] sm:$0xff] }
  0x12   : > { %1264 = vmatprep.subr.mxu0 %v399_v6  ;;  %1285 = vmatprep.mubr.msk.f32.mxu1 %vm496_vm0, %v410_v8  ;;  %v412_v20 = vld [vmem:[%s1516_s13] sm:$0xff]  ;;  %v413_v21 = vld [vmem:[%s1516_s13 + $0x8] sm:$0xff]  ;;  %v1195_v23 = vld [vmem:[%s1468_s29 + $0x18] sm:$0xff] }
  0x13   : > { %1265 = vmatpush3.msra.mxu0 %v399_v6  ;;  %1286 = vmatmul.mubr.msk.f32.vlgmr.msra.gmra.mxu1 %vm496_vm0, %v411_v9  ;;  %v1202_v24 = vld [vmem:[%s1496_s22 + $0x10] sm:$0xff]  ;;  %v1203_v25 = vld [vmem:[%s1496_s22 + $0x18] sm:$0xff]  ;;  %v1190_v30 = vld [vmem:[%s1623_s7] ss:$0 sm:$0xff] }
  0x14   : > { %1266 = vmatprep.subr.mxu0 %v398_v7  ;;  %1289 = vmatpush3.msra.mxu1 %v1450_v5  ;;  %v1196_v26 = vld [vmem:[%s1516_s13 + $0x10] sm:$0xff]  ;;  %v1197_v27 = vld [vmem:[%s1516_s13 + $0x18] sm:$0xff]  ;;  %v1189_v38 = vld [vmem:[%s1621_s5] ss:$0 sm:$0xff] }
  0x15   : > { %1267 = vmatpush3.msra.mxu0 %v398_v7  ;;  %1290 = vmatprep.subr.mxu1 %v1479_v10 }
  0x16   : > { %1268 = vmatprep.subr.mxu0 %v397_v11  ;;  %1291 = vmatpush3.msra.mxu1 %v1479_v10 }
  0x17   : > { %1269 = vmatpush3.msra.mxu0 %v397_v11  ;;  %1292 = vmatprep.subr.mxu1 %v405_v12 }
  0x18   : > { %1270 = vmatprep.subr.mxu0 %v396_v13  ;;  %1293 = vmatpush3.msra.mxu1 %v405_v12 }
  0x19   : > { %1271 = vmatpush3.msra.mxu0 %v396_v13  ;;  %1294 = vmatprep.subr.mxu1 %v404_v14 }
  0x1a   : > { %1272 = vmatprep.subr.mxu0 %v395_v15  ;;  %1295 = vmatpush3.msra.mxu1 %v404_v14 }
  0x1b   : > { %1296 = vmatprep.mubr.msk.f32.mxu1 %vm622_vm1, %v614_v16  ;;  %1273 = vmatpush3.msra.mxu0 %v395_v15 }
  0x1c   : > { %1297 = vmatmul.mubr.msk.f32.vlgmr.msra.gmra.mxu1 %vm622_vm1, %v615_v17  ;;  %1299 = vmatprep.subr.mxu1 %v402_v0 }
  0x1d   : > { %1274 = vmatprep.subr.mxu0 %v394_v18  ;;  %1300 = vmatpush3.msra.mxu1 %v402_v0 }
  0x1e   : > { %1275 = vmatpush3.msra.mxu0 %v394_v18  ;;  %1301 = vmatprep.subr.mxu1 %v1428_v1 }
  0x1f   : > { %1276 = vmatprep.subr.mxu0 %v393_v19  ;;  %1302 = vmatpush3.msra.mxu1 %v1428_v1 }
  0x20   : > { %1277 = vmatpush3.msra.mxu0 %v393_v19  ;;  %1278 = vmatprep.mubr.msk.f32.mxu0 %vm414_vm2, %v412_v20 }
  0x21   : > { %1303 = vmatprep.subr.mxu1 %v1444_v4  ;;  %1279 = vmatmul.mubr.msk.f32.vlgmr.msra.gmra.mxu0 %vm414_vm2, %v413_v21 }
  0x22   : > { %1304 = vmatpush3.msra.mxu1 %v1444_v4  ;;  %1322 = vmatprep.subr.mxu0 %v1433_v2 }
  0x23   : > { %1305 = vmatprep.subr.mxu1 %v399_v6  ;;  %1323 = vmatpush3.msra.mxu0 %v1433_v2 }
  0x24   : > { %1306 = vmatpush3.msra.mxu1 %v399_v6  ;;  %1324 = vmatprep.subr.mxu0 %v1439_v3 }
  0x25   : > { %1307 = vmatprep.subr.mxu1 %v398_v7  ;;  %1325 = vmatpush3.msra.mxu0 %v1439_v3 }
  0x26   : > { %1308 = vmatpush3.msra.mxu1 %v398_v7  ;;  %1326 = vmatprep.mubr.msk.f32.mxu0 %vm496_vm0, %v1194_v22 }
  0x27   : > { %1329 = vmatprep.subr.mxu0 %v1450_v5  ;;  %1309 = vmatprep.subr.mxu1 %v397_v11 }
  0x28   : > { %1327 = vmatmul.mubr.msk.f32.vlgmr.msra.gmra.mxu0 %vm496_vm0, %v1195_v23  ;;  %1310 = vmatpush3.msra.mxu1 %v397_v11 }
  0x29   : > { %1330 = vmatpush3.msra.mxu0 %v1450_v5  ;;  %1311 = vmatprep.subr.mxu1 %v396_v13 }
  0x2a   : > { %1331 = vmatprep.subr.mxu0 %v1479_v10  ;;  %1312 = vmatpush3.msra.mxu1 %v396_v13 }
  0x2b   : > { %1332 = vmatpush3.msra.mxu0 %v1479_v10  ;;  %1313 = vmatprep.subr.mxu1 %v395_v15 }
  0x2c   : > { %1333 = vmatprep.subr.mxu0 %v405_v12  ;;  %1314 = vmatpush3.msra.mxu1 %v395_v15 }
  0x2d   : > { %1334 = vmatpush3.msra.mxu0 %v405_v12  ;;  %1315 = vmatprep.subr.mxu1 %v394_v18 }
  0x2e   : > { %1335 = vmatprep.subr.mxu0 %v404_v14  ;;  %1337 = vmatprep.mubr.msk.f32.mxu0 %vm622_vm1, %v1202_v24 }
  0x2f   : > { %1336 = vmatpush3.msra.mxu0 %v404_v14  ;;  %1316 = vmatpush3.msra.mxu1 %v394_v18 }
  0x30   : > { %1338 = vmatmul.mubr.msk.f32.vlgmr.msra.gmra.mxu0 %vm622_vm1, %v1203_v25  ;;  %1317 = vmatprep.subr.mxu1 %v393_v19 }
  0x31   : > { %1319 = vmatprep.mubr.msk.f32.mxu1 %vm414_vm2, %v1196_v26  ;;  %1318 = vmatpush3.msra.mxu1 %v393_v19 }
  0x32   : > { %1320 = vmatmul.mubr.msk.f32.vlgmr.msra.gmra.mxu1 %vm414_vm2, %v1197_v27 }
  0xd3   : > { %v1287_v28 = vpop.f32.mrf.mxu1 }
  0xd5   : > { %v569_v29 = vpop.f32.mrf.mxu1 }
  0xdc   : > { %v1298_v31 = vpop.f32.mrf.mxu1 }
  0xdd   : > { %v701_v32 = vadd.f32 %v1298_v31, %v1190_v30 }
  0xde   : > { %v695_v33 = vpop.f32.mrf.mxu1 }
  0xdf   : > { %v705_v34 = vsel %vm496_vm0, %v701_v32, 0.0  ;;  %v696_v35 = vadd.f32 %v1190_v30, %v695_v33 }
  0xe1   : > { %v704_v36 = vsel %vm496_vm0, %v696_v35, 0.0  ;;  %v1280_v39 = vpop.f32.mrf.mxu0 }
  0xe2   : > { %v706_v37 = vadd.f32 %v705_v34, %v704_v36  ;;  %v575_v40 = vadd.f32 %v1287_v28, %v1280_v39 }
  0xe3   : > { %v487_v42 = vpop.f32.mrf.mxu0 }
  0xe4   : > { %v707_v41 = vrot.slane %v706_v37, 4  ;;  %v585_v43 = vadd.f32 %v1189_v38, %v575_v40  ;;  %v570_v44 = vadd.f32 %v569_v29, %v487_v42 }
  0xe6   : > { %v708_v45 = vadd.f32 %v707_v41, %v706_v37  ;;  %v584_v46 = vadd.f32 %v1189_v38, %v570_v44  ;;  %v587_v49 = vsel %vm496_vm0, %v585_v43, 0.0 }
  0xe8   : > { %v709_v47 = vrot.slane %v708_v45, 2  ;;  %v1328_v48 = vpop.f32.mrf.mxu0  ;;  %v586_v50 = vsel %vm496_vm0, %v584_v46, 0.0 }
  0xe9   : > { %v588_v52 = vadd.f32 %v587_v49, %v586_v50 }
  0xea   : > { %v710_v51 = vadd.f32 %v709_v47, %v708_v45  ;;  %v916_v55 = vpop.f32.mrf.mxu0 }
  0xeb   : > { %v589_v54 = vrot.slane %v588_v52, 4 }
  0xec   : > { %v711_v53 = vrot.slane %v710_v51, 1 }
  0xed   : > { %v590_v57 = vadd.f32 %v589_v54, %v588_v52 }
  0xee   : > { %v712_v56 = vadd.f32 %v711_v53, %v710_v51 }
  0xef   : > { %v591_v59 = vrot.slane %v590_v57, 2 }
  0xf0   : > { %v713_v58 = vmul.f32 0.0625, %v712_v56  ;;  %v1339_v60 = vpop.f32.mrf.mxu0 }
  0xf1   : > { %v1036_v61 = vadd.f32 %v1339_v60, %v1190_v30  ;;  %v592_v0 = vadd.f32 %v591_v59, %v590_v57 }
  0xf2   : > { %v1560_v62 = vsub.f32 %v696_v35, %v713_v58  ;;  %v1562_v63 = vsub.f32 %v701_v32, %v713_v58  ;;  %v1030_v1 = vpop.f32.mrf.mxu0  ;;  %v1321_v4 = vpop.f32.mrf.mxu1 }
  0xf3   : > { %v1040_v2 = vsel %vm496_vm0, %v1036_v61, 0.0  ;;  %v1031_v3 = vadd.f32 %v1190_v30, %v1030_v1  ;;  %v593_v7 = vrot.slane %v592_v0, 1  ;;  %v922_v8 = vadd.f32 %v1328_v48, %v1321_v4 }
  0xf4   : > { %v716_v5 = vmul.f32 %v1560_v62, %v1560_v62  ;;  %v717_v6 = vmul.f32 %v1562_v63, %v1562_v63  ;;  %v835_v10 = vpop.f32.mrf.mxu1 }
  0xf5   : > { %v1039_v9 = vsel %vm496_vm0, %v1031_v3, 0.0  ;;  %v594_v13 = vadd.f32 %v593_v7, %v592_v0  ;;  %v926_v16 = vadd.f32 %v1189_v38, %v922_v8  ;;  %v917_v17 = vadd.f32 %v916_v55, %v835_v10 }
  0xf6   : > { %v718_v11 = vsel %vm496_vm0, %v716_v5, 0.0  ;;  %v719_v12 = vsel %vm496_vm0, %v717_v6, 0.0  ;;  %v1041_v14 = vadd.f32 %v1040_v2, %v1039_v9 }
  0xf7   : > { %v720_v15 = vadd.f32 %v719_v12, %v718_v11  ;;  %v595_v18 = vmul.f32 0.0625, %v594_v13  ;;  %v925_v21 = vadd.f32 %v1189_v38, %v917_v17  ;;  %v928_v26 = vsel %vm496_vm0, %v926_v16, 0.0 }
  0xf8   : > { %v1042_v19 = vrot.slane %v1041_v14, 4 }
  0xf9   : > { %v721_v20 = vrot.slane %v720_v15, 4  ;;  %v1572_v22 = vsub.f32 %v584_v46, %v595_v18  ;;  %v1574_v23 = vsub.f32 %v585_v43, %v595_v18  ;;  %v927_v27 = vsel %vm496_vm0, %v925_v21, 0.0 }
  0xfa   : > { %v1043_v24 = vadd.f32 %v1042_v19, %v1041_v14  ;;  %v929_v31 = vadd.f32 %v928_v26, %v927_v27 }
  0xfb   : > { %v722_v25 = vadd.f32 %v721_v20, %v720_v15  ;;  %v598_v28 = vmul.f32 %v1572_v22, %v1572_v22  ;;  %v599_v29 = vmul.f32 %v1574_v23, %v1574_v23 }
  0xfc   : > { %v1044_v30 = vrot.slane %v1043_v24, 2  ;;  %v930_v36 = vrot.slane %v929_v31, 4 }
  0xfd   : > { %v723_v32 = vrot.slane %v722_v25, 2  ;;  %v600_v33 = vsel %vm496_vm0, %v598_v28, 0.0  ;;  %v601_v34 = vsel %vm496_vm0, %v599_v29, 0.0 }
  0xfe   : > { %v1045_v35 = vadd.f32 %v1044_v30, %v1043_v24  ;;  %v602_v38 = vadd.f32 %v601_v34, %v600_v33  ;;  %v931_v40 = vadd.f32 %v930_v36, %v929_v31 }
  0xff   : > { %v724_v37 = vadd.f32 %v723_v32, %v722_v25 }
 0x100   : > { %v1046_v39 = vrot.slane %v1045_v35, 1  ;;  %v603_v42 = vrot.slane %v602_v38, 4  ;;  %v932_v44 = vrot.slane %v931_v40, 2 }
 0x101   : > { %v725_v41 = vrot.slane %v724_v37, 1 }
 0x102   : > { %v1047_v43 = vadd.f32 %v1046_v39, %v1045_v35  ;;  %v604_v46 = vadd.f32 %v603_v42, %v602_v38  ;;  %v933_v48 = vadd.f32 %v932_v44, %v931_v40  ;;  %v1193_v38 = vld [vmem:[%s1624_s8] ss:$0 sm:$0xff] }
 0x103   : > { %v726_v45 = vadd.f32 %v725_v41, %v724_v37 }
 0x104   : > { %v1048_v47 = vmul.f32 0.0625, %v1047_v43  ;;  %v605_v49 = vrot.slane %v604_v46, 2  ;;  %v934_v53 = vrot.slane %v933_v48, 1 }
 0x105   : > { %v727_v50 = vmul.f32 0.0625, %v726_v45 }
 0x106   : > { %v1584_v51 = vsub.f32 %v1031_v3, %v1048_v47  ;;  %v1586_v52 = vsub.f32 %v1036_v61, %v1048_v47  ;;  %v606_v54 = vadd.f32 %v605_v49, %v604_v46  ;;  %v935_v57 = vadd.f32 %v934_v53, %v933_v48 }
 0x107   : > { %v728_v59 = vadd.f32 1e-05, %v727_v50 }
 0x108   : > { %v1051_v55 = vmul.f32 %v1584_v51, %v1584_v51  ;;  %v1052_v56 = vmul.f32 %v1586_v52, %v1586_v52  ;;  %v607_v58 = vrot.slane %v606_v54, 1  ;;  %v936_v1 = vmul.f32 0.0625, %v935_v57 }
 0x109   : > { %1348 = vrsqrt.f32 %v728_v59 }
 0x10a   : > { %v1053_v60 = vsel %vm496_vm0, %v1051_v55, 0.0  ;;  %v1054_v0 = vsel %vm496_vm0, %v1052_v56, 0.0  ;;  %v608_v2 = vadd.f32 %v607_v58, %v606_v54  ;;  %v937_v61 = vsub.f32 %v925_v21, %v936_v1 }
 0x10b   : > { %v1055_v3 = vadd.f32 %v1054_v0, %v1053_v60  ;;  %v938_v4 = vsub.f32 %v926_v16, %v936_v1 }
 0x10c   : > { %v609_v5 = vmul.f32 0.0625, %v608_v2  ;;  %v939_v7 = vmul.f32 %v937_v61, %v937_v61 }
 0x10d   : > { %v1056_v6 = vrot.slane %v1055_v3, 4  ;;  %v940_v8 = vmul.f32 %v938_v4, %v938_v4 }
 0x10e   : > { %v610_v9 = vadd.f32 1e-05, %v609_v5  ;;  %v941_v11 = vsel %vm496_vm0, %v939_v7, 0.0 }
 0x10f   : > { %v1057_v10 = vadd.f32 %v1056_v6, %v1055_v3  ;;  %v942_v12 = vsel %vm496_vm0, %v940_v8, 0.0 }
 0x110   : > { %1350 = vrsqrt.f32 %v610_v9  ;;  %v943_v14 = vadd.f32 %v942_v12, %v941_v11 }
 0x111   : > { %v1058_v13 = vrot.slane %v1057_v10, 2 }
 0x112   : > { %v944_v17 = vrot.slane %v943_v14, 4 }
 0x113   : > { %v1059_v15 = vadd.f32 %v1058_v13, %v1057_v10 }
 0x114   : > { %v945_v19 = vadd.f32 %v944_v17, %v943_v14 }
 0x115   : > { %v1060_v18 = vrot.slane %v1059_v15, 1 }
 0x116   : > { %v946_v16 = vrot.slane %v945_v19, 2  ;;  %v1349_v25 = vpop.eup %1348 }
 0x117   : > { %v1061_v20 = vadd.f32 %v1060_v18, %v1059_v15  ;;  %v730_v30 = vmul.f32 %v1349_v25, %v1560_v62  ;;  %v731_v31 = vmul.f32 %v1349_v25, %v1562_v63 }
 0x118   : > { %v947_v24 = vadd.f32 %v946_v16, %v945_v19 }
 0x119   : > { %v1062_v21 = vmul.f32 0.0625, %v1061_v20 }
 0x11a   : > { %v948_v26 = vrot.slane %v947_v24, 1 }
 0x11b   : > { %v1063_v27 = vadd.f32 1e-05, %v1062_v21 }
 0x11c   : > { %v949_v28 = vadd.f32 %v948_v26, %v947_v24 }
 0x11d   : > { %v1351_v29 = vpop.eup %1350  ;;  %1352 = vrsqrt.f32 %v1063_v27 }
 0x11e   : > { %v612_v32 = vmul.f32 %v1351_v29, %v1572_v22  ;;  %v950_v33 = vmul.f32 0.0625, %v949_v28  ;;  %v613_v34 = vmul.f32 %v1351_v29, %v1574_v23 }
 0x120   : > { %v951_v35 = vadd.f32 1e-05, %v950_v33  ;;  %v732_v36 = vadd.f32 %v730_v30, %v612_v32  ;;  %v733_v37 = vadd.f32 %v731_v31, %v613_v34 }
 0x122   : > { %1354 = vrsqrt.f32 %v951_v35  ;;  %vm734_vm3 = vcmp.ge.f32.partialorder %v732_v36, 0.0  ;;  %v736_v39 = vmul.f32 0.01, %v732_v36  ;;  %vm735_vm4 = vcmp.ge.f32.partialorder %v733_v37, 0.0 }
 0x123   : > { %v737_v62 = vmul.f32 0.01, %v733_v37 }
 0x124   : > { %v738_v40 = vsel %vm734_vm3, %v732_v36, %v736_v39 }
 0x125   : > { %v746_v63 = vmul.f32 %v1193_v38, %v738_v40  ;;  %v739_v41 = vsel %vm735_vm4, %v733_v37, %v737_v62 }
 0x126   : > { %v747_v42 = vmul.f32 %v1193_v38, %v739_v41 }
 0x127   : > { %v748_v22 = vsel %vm496_vm0, %v746_v63, 0.0 }
 0x128   : > { %749 = vadd.xlane.f32.xlu0 %v748_v22  ;;  %v751_v23 = vsel %vm496_vm0, %v747_v42, 0.0 }
 0x12a   : > { %v1353_v43 = vpop.eup %1352 }
 0x12b   : > { %v1065_v45 = vmul.f32 %v1353_v43, %v1584_v51  ;;  %v1066_v46 = vmul.f32 %v1353_v43, %v1586_v52 }
 0x12c   : > { %752 = vadd.xlane.f32.xlu0 %v751_v23 }
 0x12f   : > { %v1355_v44 = vpop.eup %1354 }
 0x130   : > { %v953_v47 = vmul.f32 %v1355_v44, %v937_v61  ;;  %v954_v48 = vmul.f32 %v1355_v44, %v938_v4 }
 0x132   : > { %v1067_v49 = vadd.f32 %v1065_v45, %v953_v47  ;;  %v1068_v50 = vadd.f32 %v1066_v46, %v954_v48 }
 0x134   : > { %vm1069_vm5 = vcmp.ge.f32.partialorder %v1067_v49, 0.0  ;;  %v1071_v53 = vmul.f32 0.01, %v1067_v49  ;;  %vm1070_vm6 = vcmp.ge.f32.partialorder %v1068_v50, 0.0  ;;  %v1072_v54 = vmul.f32 0.01, %v1068_v50 }
 0x136   : > { %v1073_v55 = vsel %vm1069_vm5, %v1067_v49, %v1071_v53  ;;  %v1074_v56 = vsel %vm1070_vm6, %v1068_v50, %v1072_v54 }
 0x137   : > { %v1075_v57 = vmul.f32 %v1193_v38, %v1073_v55  ;;  %v1076_v59 = vmul.f32 %v1193_v38, %v1074_v56 }
 0x139   : > { %v1077_v58 = vsel %vm496_vm0, %v1075_v57, 0.0  ;;  %v1080_v51 = vsel %vm496_vm0, %v1076_v59, 0.0 }
 0x13a   : > { %1078 = vadd.xlane.f32.xlu1 %v1077_v58 }
 0x13e   : > { %1081 = vadd.xlane.f32.xlu1 %v1080_v51 }
 0x1b1   : > { %v750_v52 = vpop.xlane.xlu0 %749 }
 0x1b2   : > { %755 = vst.msk [vmem:[%s389_s23] sm:$0xff] %vm754_vm7, %v750_v52 }
 0x1b5   : > { %v753_v60 = vpop.xlane.xlu0 %752 }
 0x1b6   : > { %756 = vst.msk [vmem:[%s389_s23 + $0x8] sm:$0xff] %vm754_vm7, %v753_v60 }
 0x1c3   : > { %v1079_v0 = vpop.xlane.xlu1 %1078 }
 0x1c4   : > { %1206 = vst.msk [vmem:[%s389_s23 + $0x10] sm:$0xff] %vm754_vm7, %v1079_v0 }
 0x1c7   : > { %v1082_v1 = vpop.xlane.xlu1 %1081 }
 0x1c8   : > { %1207 = vst.msk [vmem:[%s389_s23 + $0x18] sm:$0xff] %vm754_vm7, %v1082_v1 }
 0x1c9 PF: > { %s19_s30 = sadd.s32 1, %s1362_s30  }
 0x1ca   : > { %p16_p4 = scmp.ge.s32.totalorder %s19_s30, 4  }
 0x1cc   :  { %18 = sbr.rel (!%p16_p4) target bundleno = 1 (0x1), region = 96 }

</bundles_post_ra>
